<compile_context>
chip_gen: v5e
topology: v5e:2x2
jax: 0.10.0
libtpu: 0.0.40
codegen_flags: <defaults>
</compile_context>

<pallas_src>
import functools

import jax
import jax.numpy as jnp
from jax import lax
from jax.experimental import pallas as pl
from jax.experimental.pallas import tpu as pltpu


def _gru_direction_kernel(gi_ref, whh_ref, bhh_ref, whead_ref, out_ref, *,
                          seq_len, batch, hidden):
    """One GRU direction's recurrence + its contribution to the fused head.

    Ref shapes (leading direction axis of size 1 selected by the grid):
      gi_ref:    (1, 3, T, B, H)  precomputed x @ W_ih + b_ih per gate (r,z,n);
                                  time already reversed for the backward dir.
      whh_ref:   (1, 3, H, H)     hidden-to-hidden weights per gate (in, out).
      bhh_ref:   (1, 3, 1, H)     hidden biases per gate.
      whead_ref: (1, H, 2L)       this direction's rows of [W_mu | W_logvar].
      out_ref:   (1, B, 2L)       partial head output (bias added in wrapper).
    """
    T, B, H = seq_len, batch, hidden

    # Hoist all loop-invariant loads / broadcasts out of the recurrence.
    w_r = whh_ref[0, 0]
    w_z = whh_ref[0, 1]
    w_n = whh_ref[0, 2]
    b_r = jnp.broadcast_to(bhh_ref[0, 0], (B, H))
    b_z = jnp.broadcast_to(bhh_ref[0, 1], (B, H))
    b_n = jnp.broadcast_to(bhh_ref[0, 2], (B, H))

    def step(t, h):
        # Only the hidden-to-hidden work remains on the serial path.
        gh_r = jnp.dot(h, w_r, preferred_element_type=jnp.float32) + b_r
        gh_z = jnp.dot(h, w_z, preferred_element_type=jnp.float32) + b_z
        gh_n = jnp.dot(h, w_n, preferred_element_type=jnp.float32) + b_n
        r = jax.nn.sigmoid(gi_ref[0, 0, t] + gh_r)
        z = jax.nn.sigmoid(gi_ref[0, 1, t] + gh_z)
        n = jnp.tanh(gi_ref[0, 2, t] + r * gh_n)       # PyTorch GRU: r * (W_hn h + b_hn)
        return (1.0 - z) * n + z * h

    h0 = jnp.zeros((B, H), jnp.float32)
    h = lax.fori_loop(0, T, step, h0, unroll=True)

    out = jnp.dot(h, whead_ref[0], preferred_element_type=jnp.float32)
    out_ref[0] = out.astype(out_ref.dtype)


def encoder_forward(x, params, *, hidden_dim, latent_dim):
    """x: (B, T, D) float32 -> (mu, logvar) each (B, latent_dim) float32.

    Params are in PyTorch layout:
      w_ih_{f,b}: (3H, D)  w_hh_{f,b}: (3H, H)  b_ih_{f,b}, b_hh_{f,b}: (3H,)
      w_mu, w_lv: (L, 2H)  b_mu, b_lv: (L,)
    Gate order along the 3H axis is (r, z, n), as in PyTorch.
    """
    B, T, D = x.shape
    H, L = hidden_dim, latent_dim

    # ---- wrapper-side prep: one big input-projection matmul per direction ----
    x_tm = jnp.transpose(x, (1, 0, 2)).reshape(T * B, D)        # (T*B, D)

    def input_proj(w_ih, b_ih):
        gi = jnp.dot(x_tm, w_ih.T) + b_ih                       # (T*B, 3H)
        return gi.reshape(T, B, 3, H).transpose(2, 0, 1, 3)     # (3, T, B, H)

    gi_f = input_proj(params["w_ih_f"], params["b_ih_f"])
    gi_b = input_proj(params["w_ih_b"], params["b_ih_b"])[:, ::-1]   # reverse time
    gi = jnp.stack([gi_f, gi_b], axis=0)                        # (2, 3, T, B, H)

    def hh_pack(w_hh, b_hh):
        w = w_hh.reshape(3, H, H).transpose(0, 2, 1)            # per gate, (in, out)
        b = b_hh.reshape(3, 1, H)
        return w, b

    whh_f, bhh_f = hh_pack(params["w_hh_f"], params["b_hh_f"])
    whh_b, bhh_b = hh_pack(params["w_hh_b"], params["b_hh_b"])
    whh = jnp.stack([whh_f, whh_b], axis=0)                     # (2, 3, H, H)
    bhh = jnp.stack([bhh_f, bhh_b], axis=0)                     # (2, 3, 1, H)

    # Fused head weights: [W_mu | W_logvar] -> (2H, 2L), split by direction.
    w_head = jnp.concatenate([params["w_mu"].T, params["w_lv"].T], axis=1)  # (2H, 2L)
    b_head = jnp.concatenate([params["b_mu"], params["b_lv"]], axis=0)      # (2L,)
    whead = jnp.stack([w_head[:H], w_head[H:]], axis=0)         # (2, H, 2L)

    kernel = functools.partial(_gru_direction_kernel,
                               seq_len=T, batch=B, hidden=H)

    partial_out = pl.pallas_call(
        kernel,
        out_shape=jax.ShapeDtypeStruct((2, B, 2 * L), jnp.float32),
        grid_spec=pltpu.PrefetchScalarGridSpec(
            num_scalar_prefetch=0,
            grid=(2,),  # one grid step per GRU direction
            in_specs=[
                pl.BlockSpec((1, 3, T, B, H), lambda d: (d, 0, 0, 0, 0)),  # gi
                pl.BlockSpec((1, 3, H, H),    lambda d: (d, 0, 0, 0)),     # W_hh
                pl.BlockSpec((1, 3, 1, H),    lambda d: (d, 0, 0, 0)),     # b_hh
                pl.BlockSpec((1, H, 2 * L),   lambda d: (d, 0, 0)),        # W_head
            ],
            out_specs=pl.BlockSpec((1, B, 2 * L), lambda d: (d, 0, 0)),
        ),
        compiler_params=pltpu.CompilerParams(
            dimension_semantics=("parallel",)),   # directions are independent
    )(gi, whh, bhh, whead)

    head = partial_out[0] + partial_out[1] + b_head[None, :]    # (B, 2L)
    return head[:, :L], head[:, L:]


# ----------------------------- pure-JAX reference -----------------------------
def encoder_reference(x, params, *, hidden_dim, latent_dim):
    """Ground-truth f32 reference (HIGHEST-precision matmuls)."""
    B, T, D = x.shape
    H = hidden_dim
    hp = functools.partial(jnp.dot, precision=lax.Precision.HIGHEST)

    def gru_dir(x_tm, w_ih, w_hh, b_ih, b_hh):
        def step(h, x_t):
            gi = hp(x_t, w_ih.T) + b_ih
            gh = hp(h, w_hh.T) + b_hh
            i_r, i_z, i_n = jnp.split(gi, 3, axis=1)
            h_r, h_z, h_n = jnp.split(gh, 3, axis=1)
            r = jax.nn.sigmoid(i_r + h_r)
            z = jax.nn.sigmoid(i_z + h_z)
            n = jnp.tanh(i_n + r * h_n)
            return (1.0 - z) * n + z * h, None

        h0 = jnp.zeros((B, H), jnp.float32)
        h_final, _ = lax.scan(step, h0, x_tm)
        return h_final

    x_tm = jnp.transpose(x, (1, 0, 2))
    h_f = gru_dir(x_tm, params["w_ih_f"], params["w_hh_f"],
                  params["b_ih_f"], params["b_hh_f"])
    h_b = gru_dir(x_tm[::-1], params["w_ih_b"], params["w_hh_b"],
                  params["b_ih_b"], params["b_hh_b"])
    h_final = jnp.concatenate([h_f, h_b], axis=1)
    mu = hp(h_final, params["w_mu"].T) + params["b_mu"]
    logvar = hp(h_final, params["w_lv"].T) + params["b_lv"]
    return mu, logvar


# ----------------------------------- setup -------------------------------------
def init_params(key, input_dim, hidden_dim, latent_dim):
    D, H, L = input_dim, hidden_dim, latent_dim
    s = 1.0 / jnp.sqrt(jnp.float32(H))
    ks = jax.random.split(key, 12)
    u = lambda k, shape: jax.random.uniform(k, shape, jnp.float32, -s, s)
    return {
        # PyTorch GRU layout, gate order (r, z, n)
        "w_ih_f": u(ks[0], (3 * H, D)), "w_hh_f": u(ks[1], (3 * H, H)),
        "b_ih_f": u(ks[2], (3 * H,)),   "b_hh_f": u(ks[3], (3 * H,)),
        "w_ih_b": u(ks[4], (3 * H, D)), "w_hh_b": u(ks[5], (3 * H, H)),
        "b_ih_b": u(ks[6], (3 * H,)),   "b_hh_b": u(ks[7], (3 * H,)),
        # Linear heads, PyTorch layout (out_features, in_features)
        "w_mu": u(ks[8], (L, 2 * H)),   "b_mu": u(ks[9], (L,)),
        "w_lv": u(ks[10], (L, 2 * H)),  "b_lv": u(ks[11], (L,)),
    }


if __name__ == "__main__":
    B, T, D = 2, 8, 4          # batch, seq_len, input_dim
    H, L = 32, 8               # hidden_dim, latent_dim

    key = jax.random.PRNGKey(0)
    kx, kp = jax.random.split(key)
    x = jax.random.normal(kx, (B, T, D), jnp.float32)
    params = init_params(kp, D, H, L)

    fwd = jax.jit(functools.partial(encoder_forward, hidden_dim=H, latent_dim=L))
    mu, logvar = fwd(x, params)
    mu = jax.block_until_ready(mu)
    logvar = jax.block_until_ready(logvar)

    mu_ref, lv_ref = encoder_reference(x, params, hidden_dim=H, latent_dim=L)
    assert mu.shape == (B, L) and logvar.shape == (B, L)
    # Kernel/wrapper use default MXU precision (bf16 passes) per the perf
    # review; reference is HIGHEST-precision f32, hence the 2e-2 tolerance.
    assert jnp.allclose(mu, mu_ref, atol=2e-2, rtol=2e-2)
    assert jnp.allclose(logvar, lv_ref, atol=2e-2, rtol=2e-2)
    assert bool(jnp.all(jnp.isfinite(mu))) and bool(jnp.all(jnp.isfinite(logvar)))

    print("KERNEL_OK")
</pallas_src>

<mosaic_0001>
module attributes {stable_mosaic.version = 11 : i64} {
  func.func @_gru_direction_kernel(%arg0: i32, %arg1: memref<1x3x8x2x32xf32, #tpu.memory_space<vmem>>, %arg2: memref<1x3x32x32xf32, #tpu.memory_space<vmem>>, %arg3: memref<1x3x1x32xf32, #tpu.memory_space<vmem>>, %arg4: memref<1x32x16xf32, #tpu.memory_space<vmem>>, %arg5: memref<1x2x16xf32, #tpu.memory_space<vmem>>) attributes {dimension_semantics = [#tpu.dimension_semantics<parallel>], iteration_bounds = array<i64: 2>, scalar_prefetch = 0 : i64, scratch_operands = 0 : i64, tpu.core_type = #tpu.core_type<tc>, window_params = [{transform_indices = @transform_0, window_bounds = array<i64: 1, 3, 8, 2, 32>}, {transform_indices = @transform_1, window_bounds = array<i64: 1, 3, 32, 32>}, {transform_indices = @transform_2, window_bounds = array<i64: 1, 3, 1, 32>}, {transform_indices = @transform_3, window_bounds = array<i64: 1, 32, 16>}, {transform_indices = @transform_4, window_bounds = array<i64: 1, 2, 16>}]} {
    %c0 = arith.constant 0 : index
    %c0_0 = arith.constant 0 : index
    %c0_1 = arith.constant 0 : index
    %c0_2 = arith.constant 0 : index
    %0 = vector.load %arg2[%c0, %c0_0, %c0_1, %c0_2] : memref<1x3x32x32xf32, #tpu.memory_space<vmem>>, vector<1x1x32x32xf32>
    %1 = vector.shape_cast %0 : vector<1x1x32x32xf32> to vector<32x32xf32>
    %c0_3 = arith.constant 0 : index
    %c1 = arith.constant 1 : index
    %c0_4 = arith.constant 0 : index
    %c0_5 = arith.constant 0 : index
    %2 = vector.load %arg2[%c0_3, %c1, %c0_4, %c0_5] : memref<1x3x32x32xf32, #tpu.memory_space<vmem>>, vector<1x1x32x32xf32>
    %3 = vector.shape_cast %2 : vector<1x1x32x32xf32> to vector<32x32xf32>
    %c0_6 = arith.constant 0 : index
    %c2 = arith.constant 2 : index
    %c0_7 = arith.constant 0 : index
    %c0_8 = arith.constant 0 : index
    %4 = vector.load %arg2[%c0_6, %c2, %c0_7, %c0_8] : memref<1x3x32x32xf32, #tpu.memory_space<vmem>>, vector<1x1x32x32xf32>
    %5 = vector.shape_cast %4 : vector<1x1x32x32xf32> to vector<32x32xf32>
    %c0_9 = arith.constant 0 : index
    %c0_10 = arith.constant 0 : index
    %c0_11 = arith.constant 0 : index
    %c0_12 = arith.constant 0 : index
    %6 = vector.load %arg3[%c0_9, %c0_10, %c0_11, %c0_12] : memref<1x3x1x32xf32, #tpu.memory_space<vmem>>, vector<1x1x1x32xf32>
    %7 = vector.shape_cast %6 : vector<1x1x1x32xf32> to vector<1x32xf32>
    %8 = vector.shape_cast %7 : vector<1x32xf32> to vector<1x32xf32>
    %9 = vector.broadcast %8 : vector<1x32xf32> to vector<2x32xf32>
    %c0_13 = arith.constant 0 : index
    %c1_14 = arith.constant 1 : index
    %c0_15 = arith.constant 0 : index
    %c0_16 = arith.constant 0 : index
    %10 = vector.load %arg3[%c0_13, %c1_14, %c0_15, %c0_16] : memref<1x3x1x32xf32, #tpu.memory_space<vmem>>, vector<1x1x1x32xf32>
    %11 = vector.shape_cast %10 : vector<1x1x1x32xf32> to vector<1x32xf32>
    %12 = vector.shape_cast %11 : vector<1x32xf32> to vector<1x32xf32>
    %13 = vector.broadcast %12 : vector<1x32xf32> to vector<2x32xf32>
    %c0_17 = arith.constant 0 : index
    %c2_18 = arith.constant 2 : index
    %c0_19 = arith.constant 0 : index
    %c0_20 = arith.constant 0 : index
    %14 = vector.load %arg3[%c0_17, %c2_18, %c0_19, %c0_20] : memref<1x3x1x32xf32, #tpu.memory_space<vmem>>, vector<1x1x1x32xf32>
    %15 = vector.shape_cast %14 : vector<1x1x1x32xf32> to vector<1x32xf32>
    %16 = vector.shape_cast %15 : vector<1x32xf32> to vector<1x32xf32>
    %17 = vector.broadcast %16 : vector<1x32xf32> to vector<2x32xf32>
    %cst = arith.constant 0.000000e+00 : f32
    %18 = vector.broadcast %cst : f32 to vector<2x32xf32>
    %c0_i32 = arith.constant 0 : i32
    %cst_21 = arith.constant dense<0.000000e+00> : vector<2x32xf32>
    %19 = tpu.matmul %18, %1, %cst_21 {dimension_numbers = #tpu.dot_dimension_numbers<[1], [0], [0], [1], [0, 0, 1, 1], [], []>} : vector<2x32xf32>, vector<32x32xf32>, vector<2x32xf32> -> vector<2x32xf32>
    %20 = arith.addf %19, %9 : vector<2x32xf32>
    %cst_22 = arith.constant dense<0.000000e+00> : vector<2x32xf32>
    %21 = tpu.matmul %18, %3, %cst_22 {dimension_numbers = #tpu.dot_dimension_numbers<[1], [0], [0], [1], [0, 0, 1, 1], [], []>} : vector<2x32xf32>, vector<32x32xf32>, vector<2x32xf32> -> vector<2x32xf32>
    %22 = arith.addf %21, %13 : vector<2x32xf32>
    %cst_23 = arith.constant dense<0.000000e+00> : vector<2x32xf32>
    %23 = tpu.matmul %18, %5, %cst_23 {dimension_numbers = #tpu.dot_dimension_numbers<[1], [0], [0], [1], [0, 0, 1, 1], [], []>} : vector<2x32xf32>, vector<32x32xf32>, vector<2x32xf32> -> vector<2x32xf32>
    %24 = arith.addf %23, %17 : vector<2x32xf32>
    %c0_24 = arith.constant 0 : index
    %c0_25 = arith.constant 0 : index
    %25 = arith.index_cast %c0_i32 : i32 to index
    %c0_26 = arith.constant 0 : index
    %c0_27 = arith.constant 0 : index
    %26 = vector.load %arg1[%c0_24, %c0_25, %25, %c0_26, %c0_27] : memref<1x3x8x2x32xf32, #tpu.memory_space<vmem>>, vector<1x1x1x2x32xf32>
    %27 = vector.shape_cast %26 : vector<1x1x1x2x32xf32> to vector<2x32xf32>
    %28 = arith.addf %27, %20 : vector<2x32xf32>
    %29 = arith.negf %28 : vector<2x32xf32>
    %30 = math.exp %29 : vector<2x32xf32>
    %cst_28 = arith.constant 1.000000e+00 : f32
    %31 = vector.broadcast %cst_28 : f32 to vector<2x32xf32>
    %32 = arith.addf %31, %30 : vector<2x32xf32>
    %33 = arith.divf %31, %32 : vector<2x32xf32>
    %c0_29 = arith.constant 0 : index
    %c1_30 = arith.constant 1 : index
    %34 = arith.index_cast %c0_i32 : i32 to index
    %c0_31 = arith.constant 0 : index
    %c0_32 = arith.constant 0 : index
    %35 = vector.load %arg1[%c0_29, %c1_30, %34, %c0_31, %c0_32] : memref<1x3x8x2x32xf32, #tpu.memory_space<vmem>>, vector<1x1x1x2x32xf32>
    %36 = vector.shape_cast %35 : vector<1x1x1x2x32xf32> to vector<2x32xf32>
    %37 = arith.addf %36, %22 : vector<2x32xf32>
    %38 = arith.negf %37 : vector<2x32xf32>
    %39 = math.exp %38 : vector<2x32xf32>
    %cst_33 = arith.constant 1.000000e+00 : f32
    %40 = vector.broadcast %cst_33 : f32 to vector<2x32xf32>
    %41 = arith.addf %40, %39 : vector<2x32xf32>
    %42 = arith.divf %40, %41 : vector<2x32xf32>
    %c0_34 = arith.constant 0 : index
    %c2_35 = arith.constant 2 : index
    %43 = arith.index_cast %c0_i32 : i32 to index
    %c0_36 = arith.constant 0 : index
    %c0_37 = arith.constant 0 : index
    %44 = vector.load %arg1[%c0_34, %c2_35, %43, %c0_36, %c0_37] : memref<1x3x8x2x32xf32, #tpu.memory_space<vmem>>, vector<1x1x1x2x32xf32>
    %45 = vector.shape_cast %44 : vector<1x1x1x2x32xf32> to vector<2x32xf32>
    %46 = arith.mulf %33, %24 : vector<2x32xf32>
    %47 = arith.addf %45, %46 : vector<2x32xf32>
    %48 = math.tanh %47 : vector<2x32xf32>
    %cst_38 = arith.constant 1.000000e+00 : f32
    %49 = vector.broadcast %cst_38 : f32 to vector<2x32xf32>
    %50 = arith.subf %49, %42 : vector<2x32xf32>
    %51 = arith.mulf %50, %48 : vector<2x32xf32>
    %52 = arith.mulf %42, %18 : vector<2x32xf32>
    %53 = arith.addf %51, %52 : vector<2x32xf32>
    %c1_i32 = arith.constant 1 : i32
    %cst_39 = arith.constant dense<0.000000e+00> : vector<2x32xf32>
    %54 = tpu.matmul %53, %1, %cst_39 {dimension_numbers = #tpu.dot_dimension_numbers<[1], [0], [0], [1], [0, 0, 1, 1], [], []>} : vector<2x32xf32>, vector<32x32xf32>, vector<2x32xf32> -> vector<2x32xf32>
    %55 = arith.addf %54, %9 : vector<2x32xf32>
    %cst_40 = arith.constant dense<0.000000e+00> : vector<2x32xf32>
    %56 = tpu.matmul %53, %3, %cst_40 {dimension_numbers = #tpu.dot_dimension_numbers<[1], [0], [0], [1], [0, 0, 1, 1], [], []>} : vector<2x32xf32>, vector<32x32xf32>, vector<2x32xf32> -> vector<2x32xf32>
    %57 = arith.addf %56, %13 : vector<2x32xf32>
    %cst_41 = arith.constant dense<0.000000e+00> : vector<2x32xf32>
    %58 = tpu.matmul %53, %5, %cst_41 {dimension_numbers = #tpu.dot_dimension_numbers<[1], [0], [0], [1], [0, 0, 1, 1], [], []>} : vector<2x32xf32>, vector<32x32xf32>, vector<2x32xf32> -> vector<2x32xf32>
    %59 = arith.addf %58, %17 : vector<2x32xf32>
    %c0_42 = arith.constant 0 : index
    %c0_43 = arith.constant 0 : index
    %60 = arith.index_cast %c1_i32 : i32 to index
    %c0_44 = arith.constant 0 : index
    %c0_45 = arith.constant 0 : index
    %61 = vector.load %arg1[%c0_42, %c0_43, %60, %c0_44, %c0_45] : memref<1x3x8x2x32xf32, #tpu.memory_space<vmem>>, vector<1x1x1x2x32xf32>
    %62 = vector.shape_cast %61 : vector<1x1x1x2x32xf32> to vector<2x32xf32>
    %63 = arith.addf %62, %55 : vector<2x32xf32>
    %64 = arith.negf %63 : vector<2x32xf32>
    %65 = math.exp %64 : vector<2x32xf32>
    %cst_46 = arith.constant 1.000000e+00 : f32
    %66 = vector.broadcast %cst_46 : f32 to vector<2x32xf32>
    %67 = arith.addf %66, %65 : vector<2x32xf32>
    %68 = arith.divf %66, %67 : vector<2x32xf32>
    %c0_47 = arith.constant 0 : index
    %c1_48 = arith.constant 1 : index
    %69 = arith.index_cast %c1_i32 : i32 to index
    %c0_49 = arith.constant 0 : index
    %c0_50 = arith.constant 0 : index
    %70 = vector.load %arg1[%c0_47, %c1_48, %69, %c0_49, %c0_50] : memref<1x3x8x2x32xf32, #tpu.memory_space<vmem>>, vector<1x1x1x2x32xf32>
    %71 = vector.shape_cast %70 : vector<1x1x1x2x32xf32> to vector<2x32xf32>
    %72 = arith.addf %71, %57 : vector<2x32xf32>
    %73 = arith.negf %72 : vector<2x32xf32>
    %74 = math.exp %73 : vector<2x32xf32>
    %cst_51 = arith.constant 1.000000e+00 : f32
    %75 = vector.broadcast %cst_51 : f32 to vector<2x32xf32>
    %76 = arith.addf %75, %74 : vector<2x32xf32>
    %77 = arith.divf %75, %76 : vector<2x32xf32>
    %c0_52 = arith.constant 0 : index
    %c2_53 = arith.constant 2 : index
    %78 = arith.index_cast %c1_i32 : i32 to index
    %c0_54 = arith.constant 0 : index
    %c0_55 = arith.constant 0 : index
    %79 = vector.load %arg1[%c0_52, %c2_53, %78, %c0_54, %c0_55] : memref<1x3x8x2x32xf32, #tpu.memory_space<vmem>>, vector<1x1x1x2x32xf32>
    %80 = vector.shape_cast %79 : vector<1x1x1x2x32xf32> to vector<2x32xf32>
    %81 = arith.mulf %68, %59 : vector<2x32xf32>
    %82 = arith.addf %80, %81 : vector<2x32xf32>
    %83 = math.tanh %82 : vector<2x32xf32>
    %cst_56 = arith.constant 1.000000e+00 : f32
    %84 = vector.broadcast %cst_56 : f32 to vector<2x32xf32>
    %85 = arith.subf %84, %77 : vector<2x32xf32>
    %86 = arith.mulf %85, %83 : vector<2x32xf32>
    %87 = arith.mulf %77, %53 : vector<2x32xf32>
    %88 = arith.addf %86, %87 : vector<2x32xf32>
    %c2_i32 = arith.constant 2 : i32
    %cst_57 = arith.constant dense<0.000000e+00> : vector<2x32xf32>
    %89 = tpu.matmul %88, %1, %cst_57 {dimension_numbers = #tpu.dot_dimension_numbers<[1], [0], [0], [1], [0, 0, 1, 1], [], []>} : vector<2x32xf32>, vector<32x32xf32>, vector<2x32xf32> -> vector<2x32xf32>
    %90 = arith.addf %89, %9 : vector<2x32xf32>
    %cst_58 = arith.constant dense<0.000000e+00> : vector<2x32xf32>
    %91 = tpu.matmul %88, %3, %cst_58 {dimension_numbers = #tpu.dot_dimension_numbers<[1], [0], [0], [1], [0, 0, 1, 1], [], []>} : vector<2x32xf32>, vector<32x32xf32>, vector<2x32xf32> -> vector<2x32xf32>
    %92 = arith.addf %91, %13 : vector<2x32xf32>
    %cst_59 = arith.constant dense<0.000000e+00> : vector<2x32xf32>
    %93 = tpu.matmul %88, %5, %cst_59 {dimension_numbers = #tpu.dot_dimension_numbers<[1], [0], [0], [1], [0, 0, 1, 1], [], []>} : vector<2x32xf32>, vector<32x32xf32>, vector<2x32xf32> -> vector<2x32xf32>
    %94 = arith.addf %93, %17 : vector<2x32xf32>
    %c0_60 = arith.constant 0 : index
    %c0_61 = arith.constant 0 : index
    %95 = arith.index_cast %c2_i32 : i32 to index
    %c0_62 = arith.constant 0 : index
    %c0_63 = arith.constant 0 : index
    %96 = vector.load %arg1[%c0_60, %c0_61, %95, %c0_62, %c0_63] : memref<1x3x8x2x32xf32, #tpu.memory_space<vmem>>, vector<1x1x1x2x32xf32>
    %97 = vector.shape_cast %96 : vector<1x1x1x2x32xf32> to vector<2x32xf32>
    %98 = arith.addf %97, %90 : vector<2x32xf32>
    %99 = arith.negf %98 : vector<2x32xf32>
    %100 = math.exp %99 : vector<2x32xf32>
    %cst_64 = arith.constant 1.000000e+00 : f32
    %101 = vector.broadcast %cst_64 : f32 to vector<2x32xf32>
    %102 = arith.addf %101, %100 : vector<2x32xf32>
    %103 = arith.divf %101, %102 : vector<2x32xf32>
    %c0_65 = arith.constant 0 : index
    %c1_66 = arith.constant 1 : index
    %104 = arith.index_cast %c2_i32 : i32 to index
    %c0_67 = arith.constant 0 : index
    %c0_68 = arith.constant 0 : index
    %105 = vector.load %arg1[%c0_65, %c1_66, %104, %c0_67, %c0_68] : memref<1x3x8x2x32xf32, #tpu.memory_space<vmem>>, vector<1x1x1x2x32xf32>
    %106 = vector.shape_cast %105 : vector<1x1x1x2x32xf32> to vector<2x32xf32>
    %107 = arith.addf %106, %92 : vector<2x32xf32>
    %108 = arith.negf %107 : vector<2x32xf32>
    %109 = math.exp %108 : vector<2x32xf32>
    %cst_69 = arith.constant 1.000000e+00 : f32
    %110 = vector.broadcast %cst_69 : f32 to vector<2x32xf32>
    %111 = arith.addf %110, %109 : vector<2x32xf32>
    %112 = arith.divf %110, %111 : vector<2x32xf32>
    %c0_70 = arith.constant 0 : index
    %c2_71 = arith.constant 2 : index
    %113 = arith.index_cast %c2_i32 : i32 to index
    %c0_72 = arith.constant 0 : index
    %c0_73 = arith.constant 0 : index
    %114 = vector.load %arg1[%c0_70, %c2_71, %113, %c0_72, %c0_73] : memref<1x3x8x2x32xf32, #tpu.memory_space<vmem>>, vector<1x1x1x2x32xf32>
    %115 = vector.shape_cast %114 : vector<1x1x1x2x32xf32> to vector<2x32xf32>
    %116 = arith.mulf %103, %94 : vector<2x32xf32>
    %117 = arith.addf %115, %116 : vector<2x32xf32>
    %118 = math.tanh %117 : vector<2x32xf32>
    %cst_74 = arith.constant 1.000000e+00 : f32
    %119 = vector.broadcast %cst_74 : f32 to vector<2x32xf32>
    %120 = arith.subf %119, %112 : vector<2x32xf32>
    %121 = arith.mulf %120, %118 : vector<2x32xf32>
    %122 = arith.mulf %112, %88 : vector<2x32xf32>
    %123 = arith.addf %121, %122 : vector<2x32xf32>
    %c3_i32 = arith.constant 3 : i32
    %cst_75 = arith.constant dense<0.000000e+00> : vector<2x32xf32>
    %124 = tpu.matmul %123, %1, %cst_75 {dimension_numbers = #tpu.dot_dimension_numbers<[1], [0], [0], [1], [0, 0, 1, 1], [], []>} : vector<2x32xf32>, vector<32x32xf32>, vector<2x32xf32> -> vector<2x32xf32>
    %125 = arith.addf %124, %9 : vector<2x32xf32>
    %cst_76 = arith.constant dense<0.000000e+00> : vector<2x32xf32>
    %126 = tpu.matmul %123, %3, %cst_76 {dimension_numbers = #tpu.dot_dimension_numbers<[1], [0], [0], [1], [0, 0, 1, 1], [], []>} : vector<2x32xf32>, vector<32x32xf32>, vector<2x32xf32> -> vector<2x32xf32>
    %127 = arith.addf %126, %13 : vector<2x32xf32>
    %cst_77 = arith.constant dense<0.000000e+00> : vector<2x32xf32>
    %128 = tpu.matmul %123, %5, %cst_77 {dimension_numbers = #tpu.dot_dimension_numbers<[1], [0], [0], [1], [0, 0, 1, 1], [], []>} : vector<2x32xf32>, vector<32x32xf32>, vector<2x32xf32> -> vector<2x32xf32>
    %129 = arith.addf %128, %17 : vector<2x32xf32>
    %c0_78 = arith.constant 0 : index
    %c0_79 = arith.constant 0 : index
    %130 = arith.index_cast %c3_i32 : i32 to index
    %c0_80 = arith.constant 0 : index
    %c0_81 = arith.constant 0 : index
    %131 = vector.load %arg1[%c0_78, %c0_79, %130, %c0_80, %c0_81] : memref<1x3x8x2x32xf32, #tpu.memory_space<vmem>>, vector<1x1x1x2x32xf32>
    %132 = vector.shape_cast %131 : vector<1x1x1x2x32xf32> to vector<2x32xf32>
    %133 = arith.addf %132, %125 : vector<2x32xf32>
    %134 = arith.negf %133 : vector<2x32xf32>
    %135 = math.exp %134 : vector<2x32xf32>
    %cst_82 = arith.constant 1.000000e+00 : f32
    %136 = vector.broadcast %cst_82 : f32 to vector<2x32xf32>
    %137 = arith.addf %136, %135 : vector<2x32xf32>
    %138 = arith.divf %136, %137 : vector<2x32xf32>
    %c0_83 = arith.constant 0 : index
    %c1_84 = arith.constant 1 : index
    %139 = arith.index_cast %c3_i32 : i32 to index
    %c0_85 = arith.constant 0 : index
    %c0_86 = arith.constant 0 : index
    %140 = vector.load %arg1[%c0_83, %c1_84, %139, %c0_85, %c0_86] : memref<1x3x8x2x32xf32, #tpu.memory_space<vmem>>, vector<1x1x1x2x32xf32>
    %141 = vector.shape_cast %140 : vector<1x1x1x2x32xf32> to vector<2x32xf32>
    %142 = arith.addf %141, %127 : vector<2x32xf32>
    %143 = arith.negf %142 : vector<2x32xf32>
    %144 = math.exp %143 : vector<2x32xf32>
    %cst_87 = arith.constant 1.000000e+00 : f32
    %145 = vector.broadcast %cst_87 : f32 to vector<2x32xf32>
    %146 = arith.addf %145, %144 : vector<2x32xf32>
    %147 = arith.divf %145, %146 : vector<2x32xf32>
    %c0_88 = arith.constant 0 : index
    %c2_89 = arith.constant 2 : index
    %148 = arith.index_cast %c3_i32 : i32 to index
    %c0_90 = arith.constant 0 : index
    %c0_91 = arith.constant 0 : index
    %149 = vector.load %arg1[%c0_88, %c2_89, %148, %c0_90, %c0_91] : memref<1x3x8x2x32xf32, #tpu.memory_space<vmem>>, vector<1x1x1x2x32xf32>
    %150 = vector.shape_cast %149 : vector<1x1x1x2x32xf32> to vector<2x32xf32>
    %151 = arith.mulf %138, %129 : vector<2x32xf32>
    %152 = arith.addf %150, %151 : vector<2x32xf32>
    %153 = math.tanh %152 : vector<2x32xf32>
    %cst_92 = arith.constant 1.000000e+00 : f32
    %154 = vector.broadcast %cst_92 : f32 to vector<2x32xf32>
    %155 = arith.subf %154, %147 : vector<2x32xf32>
    %156 = arith.mulf %155, %153 : vector<2x32xf32>
    %157 = arith.mulf %147, %123 : vector<2x32xf32>
    %158 = arith.addf %156, %157 : vector<2x32xf32>
    %c4_i32 = arith.constant 4 : i32
    %cst_93 = arith.constant dense<0.000000e+00> : vector<2x32xf32>
    %159 = tpu.matmul %158, %1, %cst_93 {dimension_numbers = #tpu.dot_dimension_numbers<[1], [0], [0], [1], [0, 0, 1, 1], [], []>} : vector<2x32xf32>, vector<32x32xf32>, vector<2x32xf32> -> vector<2x32xf32>
    %160 = arith.addf %159, %9 : vector<2x32xf32>
    %cst_94 = arith.constant dense<0.000000e+00> : vector<2x32xf32>
    %161 = tpu.matmul %158, %3, %cst_94 {dimension_numbers = #tpu.dot_dimension_numbers<[1], [0], [0], [1], [0, 0, 1, 1], [], []>} : vector<2x32xf32>, vector<32x32xf32>, vector<2x32xf32> -> vector<2x32xf32>
    %162 = arith.addf %161, %13 : vector<2x32xf32>
    %cst_95 = arith.constant dense<0.000000e+00> : vector<2x32xf32>
    %163 = tpu.matmul %158, %5, %cst_95 {dimension_numbers = #tpu.dot_dimension_numbers<[1], [0], [0], [1], [0, 0, 1, 1], [], []>} : vector<2x32xf32>, vector<32x32xf32>, vector<2x32xf32> -> vector<2x32xf32>
    %164 = arith.addf %163, %17 : vector<2x32xf32>
    %c0_96 = arith.constant 0 : index
    %c0_97 = arith.constant 0 : index
    %165 = arith.index_cast %c4_i32 : i32 to index
    %c0_98 = arith.constant 0 : index
    %c0_99 = arith.constant 0 : index
    %166 = vector.load %arg1[%c0_96, %c0_97, %165, %c0_98, %c0_99] : memref<1x3x8x2x32xf32, #tpu.memory_space<vmem>>, vector<1x1x1x2x32xf32>
    %167 = vector.shape_cast %166 : vector<1x1x1x2x32xf32> to vector<2x32xf32>
    %168 = arith.addf %167, %160 : vector<2x32xf32>
    %169 = arith.negf %168 : vector<2x32xf32>
    %170 = math.exp %169 : vector<2x32xf32>
    %cst_100 = arith.constant 1.000000e+00 : f32
    %171 = vector.broadcast %cst_100 : f32 to vector<2x32xf32>
    %172 = arith.addf %171, %170 : vector<2x32xf32>
    %173 = arith.divf %171, %172 : vector<2x32xf32>
    %c0_101 = arith.constant 0 : index
    %c1_102 = arith.constant 1 : index
    %174 = arith.index_cast %c4_i32 : i32 to index
    %c0_103 = arith.constant 0 : index
    %c0_104 = arith.constant 0 : index
    %175 = vector.load %arg1[%c0_101, %c1_102, %174, %c0_103, %c0_104] : memref<1x3x8x2x32xf32, #tpu.memory_space<vmem>>, vector<1x1x1x2x32xf32>
    %176 = vector.shape_cast %175 : vector<1x1x1x2x32xf32> to vector<2x32xf32>
    %177 = arith.addf %176, %162 : vector<2x32xf32>
    %178 = arith.negf %177 : vector<2x32xf32>
    %179 = math.exp %178 : vector<2x32xf32>
    %cst_105 = arith.constant 1.000000e+00 : f32
    %180 = vector.broadcast %cst_105 : f32 to vector<2x32xf32>
    %181 = arith.addf %180, %179 : vector<2x32xf32>
    %182 = arith.divf %180, %181 : vector<2x32xf32>
    %c0_106 = arith.constant 0 : index
    %c2_107 = arith.constant 2 : index
    %183 = arith.index_cast %c4_i32 : i32 to index
    %c0_108 = arith.constant 0 : index
    %c0_109 = arith.constant 0 : index
    %184 = vector.load %arg1[%c0_106, %c2_107, %183, %c0_108, %c0_109] : memref<1x3x8x2x32xf32, #tpu.memory_space<vmem>>, vector<1x1x1x2x32xf32>
    %185 = vector.shape_cast %184 : vector<1x1x1x2x32xf32> to vector<2x32xf32>
    %186 = arith.mulf %173, %164 : vector<2x32xf32>
    %187 = arith.addf %185, %186 : vector<2x32xf32>
    %188 = math.tanh %187 : vector<2x32xf32>
    %cst_110 = arith.constant 1.000000e+00 : f32
    %189 = vector.broadcast %cst_110 : f32 to vector<2x32xf32>
    %190 = arith.subf %189, %182 : vector<2x32xf32>
    %191 = arith.mulf %190, %188 : vector<2x32xf32>
    %192 = arith.mulf %182, %158 : vector<2x32xf32>
    %193 = arith.addf %191, %192 : vector<2x32xf32>
    %c5_i32 = arith.constant 5 : i32
    %cst_111 = arith.constant dense<0.000000e+00> : vector<2x32xf32>
    %194 = tpu.matmul %193, %1, %cst_111 {dimension_numbers = #tpu.dot_dimension_numbers<[1], [0], [0], [1], [0, 0, 1, 1], [], []>} : vector<2x32xf32>, vector<32x32xf32>, vector<2x32xf32> -> vector<2x32xf32>
    %195 = arith.addf %194, %9 : vector<2x32xf32>
    %cst_112 = arith.constant dense<0.000000e+00> : vector<2x32xf32>
    %196 = tpu.matmul %193, %3, %cst_112 {dimension_numbers = #tpu.dot_dimension_numbers<[1], [0], [0], [1], [0, 0, 1, 1], [], []>} : vector<2x32xf32>, vector<32x32xf32>, vector<2x32xf32> -> vector<2x32xf32>
    %197 = arith.addf %196, %13 : vector<2x32xf32>
    %cst_113 = arith.constant dense<0.000000e+00> : vector<2x32xf32>
    %198 = tpu.matmul %193, %5, %cst_113 {dimension_numbers = #tpu.dot_dimension_numbers<[1], [0], [0], [1], [0, 0, 1, 1], [], []>} : vector<2x32xf32>, vector<32x32xf32>, vector<2x32xf32> -> vector<2x32xf32>
    %199 = arith.addf %198, %17 : vector<2x32xf32>
    %c0_114 = arith.constant 0 : index
    %c0_115 = arith.constant 0 : index
    %200 = arith.index_cast %c5_i32 : i32 to index
    %c0_116 = arith.constant 0 : index
    %c0_117 = arith.constant 0 : index
    %201 = vector.load %arg1[%c0_114, %c0_115, %200, %c0_116, %c0_117] : memref<1x3x8x2x32xf32, #tpu.memory_space<vmem>>, vector<1x1x1x2x32xf32>
    %202 = vector.shape_cast %201 : vector<1x1x1x2x32xf32> to vector<2x32xf32>
    %203 = arith.addf %202, %195 : vector<2x32xf32>
    %204 = arith.negf %203 : vector<2x32xf32>
    %205 = math.exp %204 : vector<2x32xf32>
    %cst_118 = arith.constant 1.000000e+00 : f32
    %206 = vector.broadcast %cst_118 : f32 to vector<2x32xf32>
    %207 = arith.addf %206, %205 : vector<2x32xf32>
    %208 = arith.divf %206, %207 : vector<2x32xf32>
    %c0_119 = arith.constant 0 : index
    %c1_120 = arith.constant 1 : index
    %209 = arith.index_cast %c5_i32 : i32 to index
    %c0_121 = arith.constant 0 : index
    %c0_122 = arith.constant 0 : index
    %210 = vector.load %arg1[%c0_119, %c1_120, %209, %c0_121, %c0_122] : memref<1x3x8x2x32xf32, #tpu.memory_space<vmem>>, vector<1x1x1x2x32xf32>
    %211 = vector.shape_cast %210 : vector<1x1x1x2x32xf32> to vector<2x32xf32>
    %212 = arith.addf %211, %197 : vector<2x32xf32>
    %213 = arith.negf %212 : vector<2x32xf32>
    %214 = math.exp %213 : vector<2x32xf32>
    %cst_123 = arith.constant 1.000000e+00 : f32
    %215 = vector.broadcast %cst_123 : f32 to vector<2x32xf32>
    %216 = arith.addf %215, %214 : vector<2x32xf32>
    %217 = arith.divf %215, %216 : vector<2x32xf32>
    %c0_124 = arith.constant 0 : index
    %c2_125 = arith.constant 2 : index
    %218 = arith.index_cast %c5_i32 : i32 to index
    %c0_126 = arith.constant 0 : index
    %c0_127 = arith.constant 0 : index
    %219 = vector.load %arg1[%c0_124, %c2_125, %218, %c0_126, %c0_127] : memref<1x3x8x2x32xf32, #tpu.memory_space<vmem>>, vector<1x1x1x2x32xf32>
    %220 = vector.shape_cast %219 : vector<1x1x1x2x32xf32> to vector<2x32xf32>
    %221 = arith.mulf %208, %199 : vector<2x32xf32>
    %222 = arith.addf %220, %221 : vector<2x32xf32>
    %223 = math.tanh %222 : vector<2x32xf32>
    %cst_128 = arith.constant 1.000000e+00 : f32
    %224 = vector.broadcast %cst_128 : f32 to vector<2x32xf32>
    %225 = arith.subf %224, %217 : vector<2x32xf32>
    %226 = arith.mulf %225, %223 : vector<2x32xf32>
    %227 = arith.mulf %217, %193 : vector<2x32xf32>
    %228 = arith.addf %226, %227 : vector<2x32xf32>
    %c6_i32 = arith.constant 6 : i32
    %cst_129 = arith.constant dense<0.000000e+00> : vector<2x32xf32>
    %229 = tpu.matmul %228, %1, %cst_129 {dimension_numbers = #tpu.dot_dimension_numbers<[1], [0], [0], [1], [0, 0, 1, 1], [], []>} : vector<2x32xf32>, vector<32x32xf32>, vector<2x32xf32> -> vector<2x32xf32>
    %230 = arith.addf %229, %9 : vector<2x32xf32>
    %cst_130 = arith.constant dense<0.000000e+00> : vector<2x32xf32>
    %231 = tpu.matmul %228, %3, %cst_130 {dimension_numbers = #tpu.dot_dimension_numbers<[1], [0], [0], [1], [0, 0, 1, 1], [], []>} : vector<2x32xf32>, vector<32x32xf32>, vector<2x32xf32> -> vector<2x32xf32>
    %232 = arith.addf %231, %13 : vector<2x32xf32>
    %cst_131 = arith.constant dense<0.000000e+00> : vector<2x32xf32>
    %233 = tpu.matmul %228, %5, %cst_131 {dimension_numbers = #tpu.dot_dimension_numbers<[1], [0], [0], [1], [0, 0, 1, 1], [], []>} : vector<2x32xf32>, vector<32x32xf32>, vector<2x32xf32> -> vector<2x32xf32>
    %234 = arith.addf %233, %17 : vector<2x32xf32>
    %c0_132 = arith.constant 0 : index
    %c0_133 = arith.constant 0 : index
    %235 = arith.index_cast %c6_i32 : i32 to index
    %c0_134 = arith.constant 0 : index
    %c0_135 = arith.constant 0 : index
    %236 = vector.load %arg1[%c0_132, %c0_133, %235, %c0_134, %c0_135] : memref<1x3x8x2x32xf32, #tpu.memory_space<vmem>>, vector<1x1x1x2x32xf32>
    %237 = vector.shape_cast %236 : vector<1x1x1x2x32xf32> to vector<2x32xf32>
    %238 = arith.addf %237, %230 : vector<2x32xf32>
    %239 = arith.negf %238 : vector<2x32xf32>
    %240 = math.exp %239 : vector<2x32xf32>
    %cst_136 = arith.constant 1.000000e+00 : f32
    %241 = vector.broadcast %cst_136 : f32 to vector<2x32xf32>
    %242 = arith.addf %241, %240 : vector<2x32xf32>
    %243 = arith.divf %241, %242 : vector<2x32xf32>
    %c0_137 = arith.constant 0 : index
    %c1_138 = arith.constant 1 : index
    %244 = arith.index_cast %c6_i32 : i32 to index
    %c0_139 = arith.constant 0 : index
    %c0_140 = arith.constant 0 : index
    %245 = vector.load %arg1[%c0_137, %c1_138, %244, %c0_139, %c0_140] : memref<1x3x8x2x32xf32, #tpu.memory_space<vmem>>, vector<1x1x1x2x32xf32>
    %246 = vector.shape_cast %245 : vector<1x1x1x2x32xf32> to vector<2x32xf32>
    %247 = arith.addf %246, %232 : vector<2x32xf32>
    %248 = arith.negf %247 : vector<2x32xf32>
    %249 = math.exp %248 : vector<2x32xf32>
    %cst_141 = arith.constant 1.000000e+00 : f32
    %250 = vector.broadcast %cst_141 : f32 to vector<2x32xf32>
    %251 = arith.addf %250, %249 : vector<2x32xf32>
    %252 = arith.divf %250, %251 : vector<2x32xf32>
    %c0_142 = arith.constant 0 : index
    %c2_143 = arith.constant 2 : index
    %253 = arith.index_cast %c6_i32 : i32 to index
    %c0_144 = arith.constant 0 : index
    %c0_145 = arith.constant 0 : index
    %254 = vector.load %arg1[%c0_142, %c2_143, %253, %c0_144, %c0_145] : memref<1x3x8x2x32xf32, #tpu.memory_space<vmem>>, vector<1x1x1x2x32xf32>
    %255 = vector.shape_cast %254 : vector<1x1x1x2x32xf32> to vector<2x32xf32>
    %256 = arith.mulf %243, %234 : vector<2x32xf32>
    %257 = arith.addf %255, %256 : vector<2x32xf32>
    %258 = math.tanh %257 : vector<2x32xf32>
    %cst_146 = arith.constant 1.000000e+00 : f32
    %259 = vector.broadcast %cst_146 : f32 to vector<2x32xf32>
    %260 = arith.subf %259, %252 : vector<2x32xf32>
    %261 = arith.mulf %260, %258 : vector<2x32xf32>
    %262 = arith.mulf %252, %228 : vector<2x32xf32>
    %263 = arith.addf %261, %262 : vector<2x32xf32>
    %c7_i32 = arith.constant 7 : i32
    %cst_147 = arith.constant dense<0.000000e+00> : vector<2x32xf32>
    %264 = tpu.matmul %263, %1, %cst_147 {dimension_numbers = #tpu.dot_dimension_numbers<[1], [0], [0], [1], [0, 0, 1, 1], [], []>} : vector<2x32xf32>, vector<32x32xf32>, vector<2x32xf32> -> vector<2x32xf32>
    %265 = arith.addf %264, %9 : vector<2x32xf32>
    %cst_148 = arith.constant dense<0.000000e+00> : vector<2x32xf32>
    %266 = tpu.matmul %263, %3, %cst_148 {dimension_numbers = #tpu.dot_dimension_numbers<[1], [0], [0], [1], [0, 0, 1, 1], [], []>} : vector<2x32xf32>, vector<32x32xf32>, vector<2x32xf32> -> vector<2x32xf32>
    %267 = arith.addf %266, %13 : vector<2x32xf32>
    %cst_149 = arith.constant dense<0.000000e+00> : vector<2x32xf32>
    %268 = tpu.matmul %263, %5, %cst_149 {dimension_numbers = #tpu.dot_dimension_numbers<[1], [0], [0], [1], [0, 0, 1, 1], [], []>} : vector<2x32xf32>, vector<32x32xf32>, vector<2x32xf32> -> vector<2x32xf32>
    %269 = arith.addf %268, %17 : vector<2x32xf32>
    %c0_150 = arith.constant 0 : index
    %c0_151 = arith.constant 0 : index
    %270 = arith.index_cast %c7_i32 : i32 to index
    %c0_152 = arith.constant 0 : index
    %c0_153 = arith.constant 0 : index
    %271 = vector.load %arg1[%c0_150, %c0_151, %270, %c0_152, %c0_153] : memref<1x3x8x2x32xf32, #tpu.memory_space<vmem>>, vector<1x1x1x2x32xf32>
    %272 = vector.shape_cast %271 : vector<1x1x1x2x32xf32> to vector<2x32xf32>
    %273 = arith.addf %272, %265 : vector<2x32xf32>
    %274 = arith.negf %273 : vector<2x32xf32>
    %275 = math.exp %274 : vector<2x32xf32>
    %cst_154 = arith.constant 1.000000e+00 : f32
    %276 = vector.broadcast %cst_154 : f32 to vector<2x32xf32>
    %277 = arith.addf %276, %275 : vector<2x32xf32>
    %278 = arith.divf %276, %277 : vector<2x32xf32>
    %c0_155 = arith.constant 0 : index
    %c1_156 = arith.constant 1 : index
    %279 = arith.index_cast %c7_i32 : i32 to index
    %c0_157 = arith.constant 0 : index
    %c0_158 = arith.constant 0 : index
    %280 = vector.load %arg1[%c0_155, %c1_156, %279, %c0_157, %c0_158] : memref<1x3x8x2x32xf32, #tpu.memory_space<vmem>>, vector<1x1x1x2x32xf32>
    %281 = vector.shape_cast %280 : vector<1x1x1x2x32xf32> to vector<2x32xf32>
    %282 = arith.addf %281, %267 : vector<2x32xf32>
    %283 = arith.negf %282 : vector<2x32xf32>
    %284 = math.exp %283 : vector<2x32xf32>
    %cst_159 = arith.constant 1.000000e+00 : f32
    %285 = vector.broadcast %cst_159 : f32 to vector<2x32xf32>
    %286 = arith.addf %285, %284 : vector<2x32xf32>
    %287 = arith.divf %285, %286 : vector<2x32xf32>
    %c0_160 = arith.constant 0 : index
    %c2_161 = arith.constant 2 : index
    %288 = arith.index_cast %c7_i32 : i32 to index
    %c0_162 = arith.constant 0 : index
    %c0_163 = arith.constant 0 : index
    %289 = vector.load %arg1[%c0_160, %c2_161, %288, %c0_162, %c0_163] : memref<1x3x8x2x32xf32, #tpu.memory_space<vmem>>, vector<1x1x1x2x32xf32>
    %290 = vector.shape_cast %289 : vector<1x1x1x2x32xf32> to vector<2x32xf32>
    %291 = arith.mulf %278, %269 : vector<2x32xf32>
    %292 = arith.addf %290, %291 : vector<2x32xf32>
    %293 = math.tanh %292 : vector<2x32xf32>
    %cst_164 = arith.constant 1.000000e+00 : f32
    %294 = vector.broadcast %cst_164 : f32 to vector<2x32xf32>
    %295 = arith.subf %294, %287 : vector<2x32xf32>
    %296 = arith.mulf %295, %293 : vector<2x32xf32>
    %297 = arith.mulf %287, %263 : vector<2x32xf32>
    %298 = arith.addf %296, %297 : vector<2x32xf32>
    %c8_i32 = arith.constant 8 : i32
    %c0_165 = arith.constant 0 : index
    %c0_166 = arith.constant 0 : index
    %c0_167 = arith.constant 0 : index
    %299 = vector.load %arg4[%c0_165, %c0_166, %c0_167] : memref<1x32x16xf32, #tpu.memory_space<vmem>>, vector<1x32x16xf32>
    %300 = vector.shape_cast %299 : vector<1x32x16xf32> to vector<32x16xf32>
    %cst_168 = arith.constant dense<0.000000e+00> : vector<2x16xf32>
    %301 = tpu.matmul %298, %300, %cst_168 {dimension_numbers = #tpu.dot_dimension_numbers<[1], [0], [0], [1], [0, 0, 1, 1], [], []>} : vector<2x32xf32>, vector<32x16xf32>, vector<2x16xf32> -> vector<2x16xf32>
    %c0_169 = arith.constant 0 : index
    %c0_170 = arith.constant 0 : index
    %c0_171 = arith.constant 0 : index
    %302 = vector.load %arg5[%c0_169, %c0_170, %c0_171] : memref<1x2x16xf32, #tpu.memory_space<vmem>>, vector<1x2x16xf32>
    %303 = vector.shape_cast %302 : vector<1x2x16xf32> to vector<2x16xf32>
    %304 = vector.shape_cast %301 : vector<2x16xf32> to vector<1x2x16xf32>
    tpu.vector_store %arg5[%c0_169, %c0_170, %c0_171], %304 {strides = array<i32>} : memref<1x2x16xf32, #tpu.memory_space<vmem>>, vector<1x2x16xf32>,
    return
  }
  func.func @transform_0(%arg0: i32) -> (i32, i32, i32, i32, i32) {
    %c0_i32 = arith.constant 0 : i32
    %c0_i32_0 = arith.constant 0 : i32
    %c0_i32_1 = arith.constant 0 : i32
    %c0_i32_2 = arith.constant 0 : i32
    %c0_i32_3 = arith.constant 0 : i32
    return %arg0, %c0_i32, %c0_i32_0, %c0_i32_1, %c0_i32_2 : i32, i32, i32, i32, i32
  }
  func.func @transform_1(%arg0: i32) -> (i32, i32, i32, i32) {
    %c0_i32 = arith.constant 0 : i32
    %c0_i32_0 = arith.constant 0 : i32
    %c0_i32_1 = arith.constant 0 : i32
    %c0_i32_2 = arith.constant 0 : i32
    return %arg0, %c0_i32, %c0_i32_0, %c0_i32_1 : i32, i32, i32, i32
  }
  func.func @transform_2(%arg0: i32) -> (i32, i32, i32, i32) {
    %c0_i32 = arith.constant 0 : i32
    %c0_i32_0 = arith.constant 0 : i32
    %c0_i32_1 = arith.constant 0 : i32
    %c0_i32_2 = arith.constant 0 : i32
    return %arg0, %c0_i32, %c0_i32_0, %c0_i32_1 : i32, i32, i32, i32
  }
  func.func @transform_3(%arg0: i32) -> (i32, i32, i32) {
    %c0_i32 = arith.constant 0 : i32
    %c0_i32_0 = arith.constant 0 : i32
    %c0_i32_1 = arith.constant 0 : i32
    return %arg0, %c0_i32, %c0_i32_0 : i32, i32, i32
  }
  func.func @transform_4(%arg0: i32) -> (i32, i32, i32) {
    %c0_i32 = arith.constant 0 : i32
    %c0_i32_0 = arith.constant 0 : i32
    %c0_i32_1 = arith.constant 0 : i32
    return %arg0, %c0_i32, %c0_i32_0 : i32, i32, i32
  }
}

</mosaic_0001>

<bundles_post_ra>
// kernel: encoder_forward.1
= control target key start
LH: loop header
LB: loop body
LE: loop exit
PB: predicated region body
PF: predicated region fallthrough
CT: control target
= control target key end

     0   :  { %s1540_s15 = smov 0   ;;  %s1812_s0 = inlined_call_operand.vmem [shape: f32[2,3,8,2,32], index: 0, kind: input, shape index: {}]   ;;  %s1813_s1 = inlined_call_operand.vmem [shape: f32[2,3,32,32], index: 1, kind: input, shape index: {}]   ;;  %s1814_s2 = inlined_call_operand.vmem [shape: f32[2,3,1,32], index: 2, kind: input, shape index: {}]   ;;  %s1815_s3 = inlined_call_operand.vmem [shape: f32[2,32,16], index: 3, kind: input, shape index: {}]   ;;  %s1816_s4 = inlined_call_operand.vmem [shape: f32[2,2,16], index: 4, kind: output, shape index: {}]  }
   0x1 LB: > { %s1327_s16 = sadd.s32 4294967295, %s1512_s15   ;;  %p1331_p0 = scmp.ge.s32.totalorder %s1512_s15, 1  ;;  %s1512_s15 = sphi %s1540_s15, %s14_s15  }
   0x2   : > { %p191_p1 = scmp.lt.s32.totalorder %s1512_s15, 3 }
   0x4   : > { %p192_p2 = pnand %p1331_p0, %p191_p1 }
   0x5   : > { %p230_p3 = scmp.lt.s32.totalorder (!%p192_p2), %s1327_s16, 1 }
   0x6   : > { %195 = sbr.rel (%p192_p2) target bundleno = 1558 (0x616), region = 36 }
   0xb   : > { %s1818_s16 = smov (!%p230_p3, %s1327_s16), 1  ;;  %v1514_v11 = vmov 0.0   ;;  %vm281_vm8 = vcmask 261120  }
   0xc   : > { %s1412_s17 = smul.u32 96, %s1818_s16  ;;  %s1410_s29 = sshll.u32 %s1818_s16, 5 }
   0xd   : > { %s1413_s21 = smul.u32 3, %s1818_s16  ;;  %s248_s6 = scalar_lea.vmem %s1815_s3, %s1410_s29 }
   0xe   : > { %s239_s20 = scalar_lea.vmem %s1813_s1, %s1412_s17  ;;  %s1411_s25 = smul.u32 48, %s1818_s16 }
   0xf   : > { %v1555_v0 = vld [vmem:[%s239_s20 + $0x18] sm:$0xff]  ;;  %v1559_v2 = vld [vmem:[%s239_s20 + $0x10] sm:$0xff]  ;;  %v1565_v4 = vld [vmem:[%s239_s20 + $0x8] sm:$0xff]  ;;  %s1581_s24 = scalar_lea.vmem %s1814_s2, %s1413_s21  ;;  %s1336_s7 = sshll.u32 %s1818_s16, 1 }
  0x10   : > { %v1557_v1 = vld [vmem:[%s239_s20 + $0x38] sm:$0xff]  ;;  %297 = vmatpush.msra.mxu0 %v1555_v0  ;;  %v1563_v3 = vld [vmem:[%s239_s20 + $0x30] sm:$0xff]  ;;  %v1567_v5 = vld [vmem:[%s239_s20 + $0x28] sm:$0xff]  ;;  %412 = vmatpush.msra.mxu3 %v1555_v0  ;;  %s1632_s28 = scalar_lea.vmem %s1812_s0, %s1411_s25  ;;  %s252_s10 = scalar_lea.vmem %s1816_s4, %s1336_s7 }
  0x11   : > { %317 = vmatpush.msra.mxu1 %v1557_v1  ;;  %v1569_v6 = vld [vmem:[%s239_s20 + $0x58] sm:$0xff]  ;;  %v1574_v7 = vld [vmem:[%s239_s20] sm:$0xff]  ;;  %v1576_v8 = vld [vmem:[%s239_s20 + $0x50] sm:$0xff] }
  0x12   : > { %298 = vmatpush.msra.mxu0 %v1559_v2  ;;  %v1583_v9 = vld [vmem:[%s239_s20 + $0x20] sm:$0xff]  ;;  %337 = vmatpush.msra.mxu2 %v1569_v6  ;;  %v1590_v10 = vld [vmem:[%s239_s20 + $0x48] sm:$0xff]  ;;  %v1348_v18 = vld [vmem:[%s1632_s28 + $0x10] sm:$0x3] }
  0x13   : > { %318 = vmatpush.msra.mxu1 %v1563_v3  ;;  %413 = vmatpush.msra.mxu3 %v1559_v2  ;;  %v1595_v12 = vld [vmem:[%s239_s20 + $0x40] sm:$0xff]  ;;  %v1356_v61 = vld [vmem:[%s1632_s28 + $0x12] sm:$0x3] }
  0x14   : > { %299 = vmatpush.msra.mxu0 %v1565_v4  ;;  %338 = vmatpush.msra.mxu2 %v1576_v8  ;;  %v1635_v13 = vld [vmem:[%s1581_s24] ss:$0 sm:$0xff]  ;;  %v1638_v14 = vld [vmem:[%s1581_s24 + $0x1] ss:$0 sm:$0xff]  ;;  %v1645_v33 = vld [vmem:[%s1581_s24 + $0x2] ss:$0 sm:$0xff] }
  0x15   : > { %319 = vmatpush.msra.mxu1 %v1567_v5  ;;  %414 = vmatpush.msra.mxu3 %v1565_v4  ;;  %v345_v16 = vld [vmem:[%s1632_s28] sm:$0x3] }
  0x16   : > { %300 = vmatpush.msra.mxu0 %v1574_v7  ;;  %339 = vmatpush.msra.mxu2 %v1590_v10  ;;  %v1350_v46 = vld [vmem:[%s1632_s28 + $0x20] sm:$0x3] }
  0x17   : > { %320 = vmatpush.msra.mxu1 %v1583_v9  ;;  %301 = vmatmul.f32.vlgmr.msra.gmra.mxu0 %v1514_v11 }
  0x18   : > { %321 = vmatmul.f32.vlgmr.msra.gmra.mxu1 %v1514_v11  ;;  %432 = vmatpush.msrb.mxu0 %v1557_v1 }
  0x19   : > { %452 = vmatpush.msrb.mxu1 %v1569_v6  ;;  %415 = vmatpush.msra.mxu3 %v1574_v7 }
  0x1a   : > { %340 = vmatpush.msra.mxu2 %v1595_v12  ;;  %433 = vmatpush.msrb.mxu0 %v1563_v3 }
  0x1b   : > { %341 = vmatmul.f32.vlgmr.msra.gmra.mxu2 %v1514_v11  ;;  %453 = vmatpush.msrb.mxu1 %v1576_v8 }
  0x1c   : > { %434 = vmatpush.msrb.mxu0 %v1567_v5  ;;  %528 = vmatpush.msrb.mxu2 %v1555_v0 }
  0x1d   : > { %454 = vmatpush.msrb.mxu1 %v1590_v10  ;;  %548 = vmatpush.msrb.mxu3 %v1557_v1 }
  0x1e   : > { %435 = vmatpush.msrb.mxu0 %v1583_v9  ;;  %529 = vmatpush.msrb.mxu2 %v1559_v2 }
  0x1f   : > { %455 = vmatpush.msrb.mxu1 %v1595_v12  ;;  %549 = vmatpush.msrb.mxu3 %v1563_v3 }
  0x20   : > { %568 = vmatpush.msra.mxu0 %v1569_v6  ;;  %530 = vmatpush.msrb.mxu2 %v1565_v4 }
  0x21   : > { %644 = vmatpush.msra.mxu1 %v1555_v0  ;;  %550 = vmatpush.msrb.mxu3 %v1567_v5 }
  0x22   : > { %569 = vmatpush.msra.mxu0 %v1576_v8  ;;  %531 = vmatpush.msrb.mxu2 %v1574_v7 }
  0x23   : > { %551 = vmatpush.msrb.mxu3 %v1583_v9  ;;  %645 = vmatpush.msra.mxu1 %v1559_v2 }
  0x24   : > { %570 = vmatpush.msra.mxu0 %v1590_v10  ;;  %664 = vmatpush.msra.mxu2 %v1557_v1 }
  0x25   : > { %646 = vmatpush.msra.mxu1 %v1565_v4 }
  0x26   : > { %571 = vmatpush.msra.mxu0 %v1595_v12  ;;  %665 = vmatpush.msra.mxu2 %v1563_v3 }
  0x27   : > { %647 = vmatpush.msra.mxu1 %v1574_v7 }
  0x28   : > { %666 = vmatpush.msra.mxu2 %v1567_v5 }
  0x2a   : > { %667 = vmatpush.msra.mxu2 %v1583_v9 }
  0x94   : > { %v302_v15 = vpop.f32.mrf.mxu0 }
  0x95   : > { %v322_v17 = vpop.f32.mrf.mxu1  ;;  %v303_v19 = vadd.f32 %v1635_v13, %v302_v15 }
  0x96   : > { %v323_v20 = vadd.f32 %v1638_v14, %v322_v17 }
  0x97   : > { %v346_v21 = vadd.f32 %v345_v16, %v303_v19  ;;  %v1354_v16 = vld [vmem:[%s1632_s28 + $0x2] sm:$0x3] }
  0x98   : > { %v368_v22 = vadd.f32 %v1348_v18, %v323_v20 }
  0x99   : > { %v1347_v23 = vmul.f32 -1.442695, %v346_v21 }
  0x9a   : > { %v1349_v24 = vmul.f32 -1.442695, %v368_v22 }
  0x9b   : > { %1426 = vpow2.f32 %v1347_v23 }
  0x9c   : > { %1428 = vpow2.f32 %v1349_v24 }
  0x9e   : > { %v342_v36 = vpop.f32.mrf.mxu2 }
  0x9f   : > { %v343_v41 = vadd.f32 %v1645_v33, %v342_v36 }
  0xa1   : > { %v1427_v25 = vpop.eup %1426 }
  0xa2   : > { %v1429_v26 = vpop.eup %1428  ;;  %v350_v27 = vadd.f32 1.0, %v1427_v25 }
  0xa3   : > { %v372_v28 = vadd.f32 1.0, %v1429_v26 }
  0xa4   : > { %1430 = vrcp.f32 %v350_v27  ;;  %v362_v37 = vand.u32 2147483648, %v350_v27  ;;  %v360_v39 = vand.u32 2147483647, %v350_v27  ;;  %vm356_vm1 = vweird.f32 %v350_v27 }
  0xa5   : > { %1432 = vrcp.f32 %v372_v28  ;;  %vm378_vm4 = vweird.f32 %v372_v28  ;;  %v384_v49 = vand.u32 2147483648, %v372_v28  ;;  %v382_v50 = vand.u32 2147483647, %v372_v28 }
  0xa6   : > { %v363_v43 = vor.u32 1.1754944e-38, %v362_v37  ;;  %vm361_vm3 = vcmp.eq.f32.partialorder %v360_v39, 8.507059e+37 }
  0xa7   : > { %v385_v53 = vor.u32 1.1754944e-38, %v384_v49  ;;  %vm383_vm7 = vcmp.eq.f32.partialorder %v382_v50, 8.507059e+37 }
  0xaa   : > { %v1431_v29 = vpop.eup %1430 }
  0xab   : > { %v1433_v30 = vpop.eup %1432  ;;  %v352_v31 = vmul.f32 %v1431_v29, %v350_v27  ;;  %vm357_vm0 = vweird.f32 %v1431_v29 }
  0xac   : > { %v374_v32 = vmul.f32 %v1433_v30, %v372_v28  ;;  %vm358_vm2 = vmor %vm356_vm1, %vm357_vm0  ;;  %vm379_vm5 = vweird.f32 %v1433_v30 }
  0xad   : > { %v353_v34 = vsub.f32 1.0, %v352_v31  ;;  %vm380_vm6 = vmor %vm378_vm4, %vm379_vm5 }
  0xae   : > { %v375_v35 = vsub.f32 1.0, %v374_v32 }
  0xaf   : > { %v354_v38 = vmul.f32 %v1431_v29, %v353_v34 }
  0xb0   : > { %v376_v40 = vmul.f32 %v1433_v30, %v375_v35 }
  0xb1   : > { %v355_v42 = vadd.f32 %v1431_v29, %v354_v38 }
  0xb2   : > { %v377_v47 = vadd.f32 %v1433_v30, %v376_v40 }
  0xb3   : > { %v359_v44 = vsel %vm358_vm2, %v1431_v29, %v355_v42  ;;  %v1358_v42 = vld [vmem:[%s1632_s28 + $0x22] sm:$0x3] }
  0xb4   : > { %v364_v45 = vsel %vm361_vm3, %v363_v43, %v359_v44  ;;  %v381_v52 = vsel %vm380_vm6, %v1433_v30, %v377_v47 }
  0xb5   : > { %v390_v48 = vmul.f32 %v364_v45, %v343_v41  ;;  %v386_v54 = vsel %vm383_vm7, %v385_v53, %v381_v52 }
  0xb6   : > { %v393_v55 = vsub.f32 1.0, %v386_v54  ;;  %v395_v58 = vmul.f32 0.0, %v386_v54 }
  0xb7   : > { %v391_v51 = vadd.f32 %v1350_v46, %v390_v48 }
  0xb9   : > { %1434 = vtanh.f32 %v391_v51 }
  0xbf   : > { %v1435_v56 = vpop.eup %1434 }
  0xc0   : > { %v394_v57 = vmul.f32 %v1435_v56, %v393_v55  ;;  %v1362_v56 = vld [vmem:[%s1632_s28 + $0x4] sm:$0x3] }
  0xc2   : > { %v1649_v59 = vadd.f32 %v395_v58, %v394_v57  ;;  %v1364_v58 = vld [vmem:[%s1632_s28 + $0x14] sm:$0x3] }
  0xc4   : > { %1351 = vmatmul.msk.f32.vlgmr.msra.gmra.mxu3 %vm281_vm8, %v1649_v59  ;;  %1352 = vmatmul.msk.f32.vlgmr.msrb.gmra.mxu0 %vm281_vm8, %v1649_v59 }
  0xc5   : > { %1353 = vmatmul.msk.f32.vlgmr.msrb.gmra.mxu1 %vm281_vm8, %v1649_v59  ;;  %684 = vmatpush.msra.mxu3 %v1569_v6 }
  0xc6   : > { %760 = vmatpush.msrb.mxu0 %v1555_v0  ;;  %780 = vmatpush.msrb.mxu1 %v1557_v1 }
  0xc7   : > { %685 = vmatpush.msra.mxu3 %v1576_v8 }
  0xc8   : > { %761 = vmatpush.msrb.mxu0 %v1559_v2  ;;  %781 = vmatpush.msrb.mxu1 %v1563_v3 }
  0xc9   : > { %686 = vmatpush.msra.mxu3 %v1590_v10 }
  0xca   : > { %762 = vmatpush.msrb.mxu0 %v1565_v4  ;;  %782 = vmatpush.msrb.mxu1 %v1567_v5 }
  0xcb   : > { %687 = vmatpush.msra.mxu3 %v1595_v12 }
  0xcc   : > { %763 = vmatpush.msrb.mxu0 %v1574_v7  ;;  %783 = vmatpush.msrb.mxu1 %v1583_v9 }
 0x141   : > { %v437_v60 = vpop.f32.mrf.mxu0 }
 0x142   : > { %v438_v62 = vadd.f32 %v1638_v14, %v437_v60  ;;  %v457_v34 = vpop.f32.mrf.mxu1 }
 0x143   : > { %v458_v38 = vadd.f32 %v1645_v33, %v457_v34 }
 0x144   : > { %v484_v63 = vadd.f32 %v1356_v61, %v438_v62 }
 0x146   : > { %v1357_v11 = vmul.f32 -1.442695, %v484_v63 }
 0x147   : > { %v417_v15 = vpop.f32.mrf.mxu3 }
 0x148   : > { %1436 = vpow2.f32 %v1357_v11  ;;  %v418_v17 = vadd.f32 %v1635_v13, %v417_v15 }
 0x14a   : > { %v462_v18 = vadd.f32 %v1354_v16, %v418_v17 }
 0x14c   : > { %v1355_v19 = vmul.f32 -1.442695, %v462_v18 }
 0x14e   : > { %v1437_v20 = vpop.eup %1436  ;;  %1438 = vpow2.f32 %v1355_v19 }
 0x14f   : > { %v488_v21 = vadd.f32 1.0, %v1437_v20 }
 0x151   : > { %1440 = vrcp.f32 %v488_v21  ;;  %v500_v43 = vand.u32 2147483648, %v488_v21  ;;  %vm494_vm14 = vweird.f32 %v488_v21  ;;  %v498_v45 = vand.u32 2147483647, %v488_v21 }
 0x153   : > { %v501_v48 = vor.u32 1.1754944e-38, %v500_v43  ;;  %vm499_vm0 = vcmp.eq.f32.partialorder %v498_v45, 8.507059e+37 }
 0x154   : > { %v1439_v22 = vpop.eup %1438 }
 0x155   : > { %v466_v23 = vadd.f32 1.0, %v1439_v22 }
 0x157   : > { %1442 = vrcp.f32 %v466_v23  ;;  %v1441_v24 = vpop.eup %1440  ;;  %v478_v30 = vand.u32 2147483648, %v466_v23  ;;  %v476_v32 = vand.u32 2147483647, %v466_v23  ;;  %vm472_vm10 = vweird.f32 %v466_v23 }
 0x158   : > { %v490_v25 = vmul.f32 %v1441_v24, %v488_v21  ;;  %vm495_vm13 = vweird.f32 %v1441_v24 }
 0x159   : > { %v479_v37 = vor.u32 1.1754944e-38, %v478_v30  ;;  %vm477_vm12 = vcmp.eq.f32.partialorder %v476_v32, 8.507059e+37  ;;  %vm496_vm15 = vmor %vm494_vm14, %vm495_vm13 }
 0x15a   : > { %v491_v28 = vsub.f32 1.0, %v490_v25 }
 0x15c   : > { %v492_v35 = vmul.f32 %v1441_v24, %v491_v28 }
 0x15d   : > { %v1443_v26 = vpop.eup %1442 }
 0x15e   : > { %v468_v27 = vmul.f32 %v1443_v26, %v466_v23  ;;  %vm473_vm9 = vweird.f32 %v1443_v26  ;;  %v493_v41 = vadd.f32 %v1441_v24, %v492_v35 }
 0x15f   : > { %vm474_vm11 = vmor %vm472_vm10, %vm473_vm9 }
 0x160   : > { %v469_v29 = vsub.f32 1.0, %v468_v27  ;;  %v497_v47 = vsel %vm496_vm15, %v1441_v24, %v493_v41 }
 0x161   : > { %v502_v49 = vsel %vm499_vm0, %v501_v48, %v497_v47 }
 0x162   : > { %v470_v31 = vmul.f32 %v1443_v26, %v469_v29  ;;  %v509_v50 = vsub.f32 1.0, %v502_v49  ;;  %v511_v53 = vmul.f32 %v502_v49, %v1649_v59 }
 0x164   : > { %v471_v36 = vadd.f32 %v1443_v26, %v470_v31 }
 0x166   : > { %v475_v39 = vsel %vm474_vm11, %v1443_v26, %v471_v36 }
 0x167   : > { %v480_v40 = vsel %vm477_vm12, %v479_v37, %v475_v39  ;;  %v1366_v37 = vld [vmem:[%s1632_s28 + $0x24] sm:$0x3] }
 0x168   : > { %v506_v44 = vmul.f32 %v480_v40, %v458_v38 }
 0x16a   : > { %v507_v46 = vadd.f32 %v1358_v42, %v506_v44 }
 0x16c   : > { %1444 = vtanh.f32 %v507_v46 }
 0x172   : > { %v1445_v51 = vpop.eup %1444 }
 0x173   : > { %v510_v52 = vmul.f32 %v1445_v51, %v509_v50  ;;  %v1370_v51 = vld [vmem:[%s1632_s28 + $0x6] sm:$0x3] }
 0x175   : > { %v1676_v54 = vadd.f32 %v511_v53, %v510_v52 }
 0x177   : > { %1359 = vmatmul.msk.f32.vlgmr.msrb.gmra.mxu2 %vm281_vm8, %v1676_v54  ;;  %1360 = vmatmul.msk.f32.vlgmr.msrb.gmra.mxu3 %vm281_vm8, %v1676_v54 }
 0x178   : > { %1361 = vmatmul.msk.f32.vlgmr.msra.gmra.mxu0 %vm281_vm8, %v1676_v54  ;;  %800 = vmatpush.msrb.mxu2 %v1569_v6 }
 0x179   : > { %876 = vmatpush.msrb.mxu3 %v1555_v0  ;;  %896 = vmatpush.msra.mxu0 %v1557_v1 }
 0x17a   : > { %801 = vmatpush.msrb.mxu2 %v1576_v8 }
 0x17b   : > { %877 = vmatpush.msrb.mxu3 %v1559_v2  ;;  %897 = vmatpush.msra.mxu0 %v1563_v3 }
 0x17c   : > { %802 = vmatpush.msrb.mxu2 %v1590_v10 }
 0x17d   : > { %878 = vmatpush.msrb.mxu3 %v1565_v4  ;;  %898 = vmatpush.msra.mxu0 %v1567_v5 }
 0x17e   : > { %803 = vmatpush.msrb.mxu2 %v1595_v12 }
 0x17f   : > { %879 = vmatpush.msrb.mxu3 %v1574_v7  ;;  %899 = vmatpush.msra.mxu0 %v1583_v9 }
 0x1f5   : > { %v573_v28 = vpop.f32.mrf.mxu0 }
 0x1f6   : > { %v574_v32 = vadd.f32 %v1645_v33, %v573_v28 }
 0x1fa   : > { %v533_v55 = vpop.f32.mrf.mxu2  ;;  %v553_v57 = vpop.f32.mrf.mxu3 }
 0x1fb   : > { %v534_v59 = vadd.f32 %v1635_v13, %v533_v55  ;;  %v554_v60 = vadd.f32 %v1638_v14, %v553_v57 }
 0x1fd   : > { %v578_v61 = vadd.f32 %v1362_v56, %v534_v59  ;;  %v600_v62 = vadd.f32 %v1364_v58, %v554_v60  ;;  %v1372_v56 = vld [vmem:[%s1632_s28 + $0x16] sm:$0x3] }
 0x1ff   : > { %v1363_v63 = vmul.f32 -1.442695, %v578_v61  ;;  %v1365_v11 = vmul.f32 -1.442695, %v600_v62 }
 0x201   : > { %1446 = vpow2.f32 %v1363_v63 }
 0x202   : > { %1448 = vpow2.f32 %v1365_v11 }
 0x207   : > { %v1447_v15 = vpop.eup %1446 }
 0x208   : > { %v1449_v16 = vpop.eup %1448  ;;  %v582_v17 = vadd.f32 1.0, %v1447_v15 }
 0x209   : > { %v604_v18 = vadd.f32 1.0, %v1449_v16 }
 0x20a   : > { %1450 = vrcp.f32 %v582_v17  ;;  %v594_v24 = vand.u32 2147483648, %v582_v17  ;;  %v592_v27 = vand.u32 2147483647, %v582_v17  ;;  %vm588_vm2 = vweird.f32 %v582_v17 }
 0x20b   : > { %1452 = vrcp.f32 %v604_v18  ;;  %v616_v39 = vand.u32 2147483648, %v604_v18  ;;  %vm610_vm6 = vweird.f32 %v604_v18  ;;  %v614_v40 = vand.u32 2147483647, %v604_v18 }
 0x20c   : > { %v595_v31 = vor.u32 1.1754944e-38, %v594_v24  ;;  %vm593_vm4 = vcmp.eq.f32.partialorder %v592_v27, 8.507059e+37 }
 0x20d   : > { %v617_v43 = vor.u32 1.1754944e-38, %v616_v39  ;;  %vm615_vm9 = vcmp.eq.f32.partialorder %v614_v40, 8.507059e+37 }
 0x210   : > { %v1451_v19 = vpop.eup %1450 }
 0x211   : > { %v1453_v20 = vpop.eup %1452  ;;  %v584_v21 = vmul.f32 %v1451_v19, %v582_v17  ;;  %vm589_vm1 = vweird.f32 %v1451_v19 }
 0x212   : > { %v606_v22 = vmul.f32 %v1453_v20, %v604_v18  ;;  %vm590_vm3 = vmor %vm588_vm2, %vm589_vm1  ;;  %vm611_vm5 = vweird.f32 %v1453_v20 }
 0x213   : > { %v585_v23 = vsub.f32 1.0, %v584_v21  ;;  %vm612_vm7 = vmor %vm610_vm6, %vm611_vm5 }
 0x214   : > { %v607_v25 = vsub.f32 1.0, %v606_v22 }
 0x215   : > { %v586_v26 = vmul.f32 %v1451_v19, %v585_v23 }
 0x216   : > { %v608_v29 = vmul.f32 %v1453_v20, %v607_v25 }
 0x217   : > { %v587_v30 = vadd.f32 %v1451_v19, %v586_v26 }
 0x218   : > { %v609_v36 = vadd.f32 %v1453_v20, %v608_v29  ;;  %v1374_v29 = vld [vmem:[%s1632_s28 + $0x26] sm:$0x3] }
 0x219   : > { %v591_v34 = vsel %vm590_vm3, %v1451_v19, %v587_v30 }
 0x21a   : > { %v596_v35 = vsel %vm593_vm4, %v595_v31, %v591_v34  ;;  %v613_v42 = vsel %vm612_vm7, %v1453_v20, %v609_v36 }
 0x21b   : > { %v622_v38 = vmul.f32 %v596_v35, %v574_v32  ;;  %v618_v44 = vsel %vm615_vm9, %v617_v43, %v613_v42 }
 0x21c   : > { %v625_v45 = vsub.f32 1.0, %v618_v44  ;;  %v627_v48 = vmul.f32 %v618_v44, %v1676_v54 }
 0x21d   : > { %v623_v41 = vadd.f32 %v1366_v37, %v622_v38 }
 0x21f   : > { %1454 = vtanh.f32 %v623_v41 }
 0x225   : > { %v1455_v46 = vpop.eup %1454 }
 0x226   : > { %v626_v47 = vmul.f32 %v1455_v46, %v625_v45  ;;  %v1380_v46 = vld [vmem:[%s1632_s28 + $0x18] sm:$0x3] }
 0x228   : > { %v1703_v49 = vadd.f32 %v627_v48, %v626_v47 }
 0x22a   : > { %1367 = vmatmul.msk.f32.vlgmr.msra.gmra.mxu1 %vm281_vm8, %v1703_v49  ;;  %1368 = vmatmul.msk.f32.vlgmr.msra.gmra.mxu2 %vm281_vm8, %v1703_v49 }
 0x22b   : > { %1369 = vmatmul.msk.f32.vlgmr.msra.gmra.mxu3 %vm281_vm8, %v1703_v49  ;;  %916 = vmatpush.msra.mxu1 %v1569_v6 }
 0x22c   : > { %992 = vmatpush.msra.mxu2 %v1555_v0  ;;  %1012 = vmatpush.msra.mxu3 %v1557_v1 }
 0x22d   : > { %917 = vmatpush.msra.mxu1 %v1576_v8 }
 0x22e   : > { %993 = vmatpush.msra.mxu2 %v1559_v2  ;;  %1013 = vmatpush.msra.mxu3 %v1563_v3 }
 0x22f   : > { %918 = vmatpush.msra.mxu1 %v1590_v10 }
 0x230   : > { %994 = vmatpush.msra.mxu2 %v1565_v4  ;;  %1014 = vmatpush.msra.mxu3 %v1567_v5 }
 0x231   : > { %919 = vmatpush.msra.mxu1 %v1595_v12 }
 0x232   : > { %995 = vmatpush.msra.mxu2 %v1574_v7  ;;  %1015 = vmatpush.msra.mxu3 %v1583_v9 }
 0x2a7   : > { %v649_v50 = vpop.f32.mrf.mxu1 }
 0x2a8   : > { %v650_v52 = vadd.f32 %v1635_v13, %v649_v50 }
 0x2aa   : > { %v694_v53 = vadd.f32 %v1370_v51, %v650_v52 }
 0x2ac   : > { %v1371_v54 = vmul.f32 -1.442695, %v694_v53 }
 0x2ad   : > { %v669_v55 = vpop.f32.mrf.mxu2 }
 0x2ae   : > { %1456 = vpow2.f32 %v1371_v54  ;;  %v670_v57 = vadd.f32 %v1638_v14, %v669_v55  ;;  %v689_v21 = vpop.f32.mrf.mxu3 }
 0x2af   : > { %v690_v26 = vadd.f32 %v1645_v33, %v689_v21 }
 0x2b0   : > { %v716_v58 = vadd.f32 %v1372_v56, %v670_v57 }
 0x2b2   : > { %v1373_v59 = vmul.f32 -1.442695, %v716_v58 }
 0x2b4   : > { %v1457_v60 = vpop.eup %1456  ;;  %1458 = vpow2.f32 %v1373_v59 }
 0x2b5   : > { %v698_v61 = vadd.f32 1.0, %v1457_v60 }
 0x2b7   : > { %1460 = vrcp.f32 %v698_v61  ;;  %v710_v17 = vand.u32 2147483648, %v698_v61  ;;  %v708_v19 = vand.u32 2147483647, %v698_v61  ;;  %vm704_vm11 = vweird.f32 %v698_v61 }
 0x2b9   : > { %v711_v24 = vor.u32 1.1754944e-38, %v710_v17  ;;  %vm709_vm13 = vcmp.eq.f32.partialorder %v708_v19, 8.507059e+37 }
 0x2ba   : > { %v1459_v62 = vpop.eup %1458 }
 0x2bb   : > { %v720_v63 = vadd.f32 1.0, %v1459_v62 }
 0x2bd   : > { %v1461_v11 = vpop.eup %1460  ;;  %1462 = vrcp.f32 %v720_v63  ;;  %v732_v31 = vand.u32 2147483648, %v720_v63  ;;  %v730_v34 = vand.u32 2147483647, %v720_v63  ;;  %vm726_vm15 = vweird.f32 %v720_v63 }
 0x2be   : > { %v700_v15 = vmul.f32 %v1461_v11, %v698_v61  ;;  %vm705_vm10 = vweird.f32 %v1461_v11 }
 0x2bf   : > { %vm706_vm12 = vmor %vm704_vm11, %vm705_vm10  ;;  %v733_v37 = vor.u32 1.1754944e-38, %v732_v31  ;;  %vm731_vm1 = vcmp.eq.f32.partialorder %v730_v34, 8.507059e+37 }
 0x2c0   : > { %v701_v16 = vsub.f32 1.0, %v700_v15 }
 0x2c2   : > { %v702_v18 = vmul.f32 %v1461_v11, %v701_v16 }
 0x2c3   : > { %v1463_v20 = vpop.eup %1462 }
 0x2c4   : > { %v722_v22 = vmul.f32 %v1463_v20, %v720_v63  ;;  %v703_v23 = vadd.f32 %v1461_v11, %v702_v18  ;;  %vm727_vm14 = vweird.f32 %v1463_v20  ;;  %v1382_v18 = vld [vmem:[%s1632_s28 + $0x28] sm:$0x3] }
 0x2c5   : > { %vm728_vm0 = vmor %vm726_vm15, %vm727_vm14 }
 0x2c6   : > { %v723_v25 = vsub.f32 1.0, %v722_v22  ;;  %v707_v27 = vsel %vm706_vm12, %v1461_v11, %v703_v23 }
 0x2c7   : > { %v712_v28 = vsel %vm709_vm13, %v711_v24, %v707_v27 }
 0x2c8   : > { %v724_v30 = vmul.f32 %v1463_v20, %v723_v25  ;;  %v738_v32 = vmul.f32 %v712_v28, %v690_v26 }
 0x2ca   : > { %v725_v35 = vadd.f32 %v1463_v20, %v724_v30  ;;  %v739_v36 = vadd.f32 %v1374_v29, %v738_v32  ;;  %v1388_v32 = vld [vmem:[%s1632_s28 + $0x1a] sm:$0x3] }
 0x2cc   : > { %v729_v38 = vsel %vm728_vm0, %v1463_v20, %v725_v35  ;;  %1464 = vtanh.f32 %v739_v36 }
 0x2cd   : > { %v734_v39 = vsel %vm731_vm1, %v733_v37, %v729_v38  ;;  %v1386_v38 = vld [vmem:[%s1632_s28 + $0xa] sm:$0x3] }
 0x2ce   : > { %v741_v40 = vsub.f32 1.0, %v734_v39  ;;  %v743_v43 = vmul.f32 %v734_v39, %v1703_v49 }
 0x2d2   : > { %v1465_v41 = vpop.eup %1464 }
 0x2d3   : > { %v742_v42 = vmul.f32 %v1465_v41, %v741_v40 }
 0x2d5   : > { %v1730_v44 = vadd.f32 %v743_v43, %v742_v42 }
 0x2d7   : > { %1375 = vmatmul.msk.f32.vlgmr.msrb.gmra.mxu0 %vm281_vm8, %v1730_v44  ;;  %1376 = vmatmul.msk.f32.vlgmr.msrb.gmra.mxu1 %vm281_vm8, %v1730_v44 }
 0x2d8   : > { %1377 = vmatmul.msk.f32.vlgmr.msrb.gmra.mxu2 %vm281_vm8, %v1730_v44  ;;  %1032 = vmatpush.msrb.mxu0 %v1569_v6 }
 0x2d9   : > { %1108 = vmatpush.msrb.mxu1 %v1555_v0  ;;  %1128 = vmatpush.msrb.mxu2 %v1557_v1  ;;  %v1378_v1 = vld [vmem:[%s1632_s28 + $0x8] sm:$0x3] }
 0x2da   : > { %1033 = vmatpush.msrb.mxu0 %v1576_v8 }
 0x2db   : > { %1109 = vmatpush.msrb.mxu1 %v1559_v2  ;;  %1129 = vmatpush.msrb.mxu2 %v1563_v3 }
 0x2dc   : > { %1034 = vmatpush.msrb.mxu0 %v1590_v10 }
 0x2dd   : > { %1110 = vmatpush.msrb.mxu1 %v1565_v4  ;;  %1130 = vmatpush.msrb.mxu2 %v1567_v5 }
 0x2de   : > { %1035 = vmatpush.msrb.mxu0 %v1595_v12 }
 0x2df   : > { %1111 = vmatpush.msrb.mxu1 %v1574_v7  ;;  %1131 = vmatpush.msrb.mxu2 %v1583_v9 }
 0x354   : > { %v765_v0 = vpop.f32.mrf.mxu0  ;;  %v785_v45 = vpop.f32.mrf.mxu1 }
 0x355   : > { %v766_v2 = vadd.f32 %v1635_v13, %v765_v0  ;;  %v786_v3 = vadd.f32 %v1638_v14, %v785_v45 }
 0x357   : > { %v810_v47 = vadd.f32 %v1378_v1, %v766_v2  ;;  %v832_v48 = vadd.f32 %v1380_v46, %v786_v3 }
 0x359   : > { %v1379_v49 = vmul.f32 -1.442695, %v810_v47  ;;  %v1381_v4 = vmul.f32 -1.442695, %v832_v48 }
 0x35b   : > { %1466 = vpow2.f32 %v1379_v49  ;;  %v805_v61 = vpop.f32.mrf.mxu2 }
 0x35c   : > { %1468 = vpow2.f32 %v1381_v4  ;;  %v806_v11 = vadd.f32 %v1645_v33, %v805_v61 }
 0x361   : > { %v1467_v5 = vpop.eup %1466 }
 0x362   : > { %v1469_v50 = vpop.eup %1468  ;;  %v814_v51 = vadd.f32 1.0, %v1467_v5 }
 0x363   : > { %v836_v7 = vadd.f32 1.0, %v1469_v50 }
 0x364   : > { %1470 = vrcp.f32 %v814_v51  ;;  %v826_v57 = vand.u32 2147483648, %v814_v51  ;;  %v824_v59 = vand.u32 2147483647, %v814_v51  ;;  %vm820_vm3 = vweird.f32 %v814_v51 }
 0x365   : > { %1472 = vrcp.f32 %v836_v7  ;;  %v848_v19 = vand.u32 2147483648, %v836_v7  ;;  %vm842_vm7 = vweird.f32 %v836_v7  ;;  %v846_v21 = vand.u32 2147483647, %v836_v7 }
 0x366   : > { %v827_v63 = vor.u32 1.1754944e-38, %v826_v57  ;;  %vm825_vm5 = vcmp.eq.f32.partialorder %v824_v59, 8.507059e+37 }
 0x367   : > { %v849_v24 = vor.u32 1.1754944e-38, %v848_v19  ;;  %vm847_vm10 = vcmp.eq.f32.partialorder %v846_v21, 8.507059e+37 }
 0x36a   : > { %v1471_v9 = vpop.eup %1470 }
 0x36b   : > { %v1473_v52 = vpop.eup %1472  ;;  %v816_v53 = vmul.f32 %v1471_v9, %v814_v51  ;;  %vm821_vm2 = vweird.f32 %v1471_v9 }
 0x36c   : > { %v838_v54 = vmul.f32 %v1473_v52, %v836_v7  ;;  %vm822_vm4 = vmor %vm820_vm3, %vm821_vm2  ;;  %vm843_vm6 = vweird.f32 %v1473_v52 }
 0x36d   : > { %v817_v55 = vsub.f32 1.0, %v816_v53  ;;  %vm844_vm9 = vmor %vm842_vm7, %vm843_vm6 }
 0x36e   : > { %v839_v56 = vsub.f32 1.0, %v838_v54 }
 0x36f   : > { %v818_v58 = vmul.f32 %v1471_v9, %v817_v55 }
 0x370   : > { %v840_v60 = vmul.f32 %v1473_v52, %v839_v56 }
 0x371   : > { %v819_v62 = vadd.f32 %v1471_v9, %v818_v58 }
 0x372   : > { %v841_v17 = vadd.f32 %v1473_v52, %v840_v60 }
 0x373   : > { %v823_v15 = vsel %vm822_vm4, %v1471_v9, %v819_v62  ;;  %v1390_v9 = vld [vmem:[%s1632_s28 + $0x2a] sm:$0x3] }
 0x374   : > { %v828_v16 = vsel %vm825_vm5, %v827_v63, %v823_v15  ;;  %v845_v23 = vsel %vm844_vm9, %v1473_v52, %v841_v17  ;;  %v1394_v15 = vld [vmem:[%s1632_s28 + $0xc] sm:$0x3]  ;;  %v1396_v17 = vld [vmem:[%s1632_s28 + $0x1c] sm:$0x3] }
 0x375   : > { %v854_v20 = vmul.f32 %v828_v16, %v806_v11  ;;  %v850_v25 = vsel %vm847_vm10, %v849_v24, %v845_v23 }
 0x376   : > { %v857_v26 = vsub.f32 1.0, %v850_v25  ;;  %v859_v29 = vmul.f32 %v850_v25, %v1730_v44 }
 0x377   : > { %v855_v22 = vadd.f32 %v1382_v18, %v854_v20 }
 0x379   : > { %1474 = vtanh.f32 %v855_v22 }
 0x37f   : > { %v1475_v27 = vpop.eup %1474 }
 0x380   : > { %v858_v28 = vmul.f32 %v1475_v27, %v857_v26 }
 0x382   : > { %v1757_v30 = vadd.f32 %v859_v29, %v858_v28 }
 0x384   : > { %1383 = vmatmul.msk.f32.vlgmr.msrb.gmra.mxu3 %vm281_vm8, %v1757_v30  ;;  %1384 = vmatmul.msk.f32.vlgmr.msra.gmra.mxu0 %vm281_vm8, %v1757_v30 }
 0x385   : > { %1385 = vmatmul.msk.f32.vlgmr.msra.gmra.mxu1 %vm281_vm8, %v1757_v30  ;;  %1148 = vmatpush.msrb.mxu3 %v1569_v6 }
 0x387   : > { %1149 = vmatpush.msrb.mxu3 %v1576_v8 }
 0x389   : > { %1150 = vmatpush.msrb.mxu3 %v1590_v10 }
 0x38b   : > { %1151 = vmatpush.msrb.mxu3 %v1595_v12 }
 0x401   : > { %v901_v31 = vpop.f32.mrf.mxu0 }
 0x402   : > { %v902_v34 = vadd.f32 %v1638_v14, %v901_v31  ;;  %v921_v48 = vpop.f32.mrf.mxu1 }
 0x403   : > { %v922_v5 = vadd.f32 %v1645_v33, %v921_v48 }
 0x404   : > { %v948_v35 = vadd.f32 %v1388_v32, %v902_v34 }
 0x406   : > { %v1389_v36 = vmul.f32 -1.442695, %v948_v35 }
 0x407   : > { %v881_v37 = vpop.f32.mrf.mxu3 }
 0x408   : > { %1476 = vpow2.f32 %v1389_v36  ;;  %v882_v39 = vadd.f32 %v1635_v13, %v881_v37 }
 0x40a   : > { %v926_v40 = vadd.f32 %v1386_v38, %v882_v39 }
 0x40c   : > { %v1387_v41 = vmul.f32 -1.442695, %v926_v40 }
 0x40e   : > { %v1477_v6 = vpop.eup %1476  ;;  %1478 = vpow2.f32 %v1387_v41 }
 0x40f   : > { %v952_v8 = vadd.f32 1.0, %v1477_v6 }
 0x411   : > { %1480 = vrcp.f32 %v952_v8  ;;  %v964_v52 = vand.u32 2147483648, %v952_v8  ;;  %vm958_vm0 = vweird.f32 %v952_v8  ;;  %v962_v54 = vand.u32 2147483647, %v952_v8 }
 0x413   : > { %v965_v57 = vor.u32 1.1754944e-38, %v964_v52  ;;  %vm963_vm2 = vcmp.eq.f32.partialorder %v962_v54, 8.507059e+37 }
 0x414   : > { %v1479_v10 = vpop.eup %1478 }
 0x415   : > { %v930_v42 = vadd.f32 1.0, %v1479_v10 }
 0x417   : > { %1482 = vrcp.f32 %v930_v42  ;;  %v1481_v12 = vpop.eup %1480  ;;  %v942_v46 = vand.u32 2147483648, %v930_v42  ;;  %v940_v3 = vand.u32 2147483647, %v930_v42  ;;  %vm936_vm12 = vweird.f32 %v930_v42 }
 0x418   : > { %v954_v43 = vmul.f32 %v1481_v12, %v952_v8  ;;  %vm959_vm15 = vweird.f32 %v1481_v12 }
 0x419   : > { %v943_v4 = vor.u32 1.1754944e-38, %v942_v46  ;;  %vm941_vm14 = vcmp.eq.f32.partialorder %v940_v3, 8.507059e+37  ;;  %vm960_vm1 = vmor %vm958_vm0, %vm959_vm15 }
 0x41a   : > { %v955_v1 = vsub.f32 1.0, %v954_v43 }
 0x41c   : > { %v956_v47 = vmul.f32 %v1481_v12, %v955_v1 }
 0x41d   : > { %v1483_v44 = vpop.eup %1482 }
 0x41e   : > { %v932_v0 = vmul.f32 %v1483_v44, %v930_v42  ;;  %vm937_vm11 = vweird.f32 %v1483_v44  ;;  %v957_v7 = vadd.f32 %v1481_v12, %v956_v47 }
 0x41f   : > { %vm938_vm13 = vmor %vm936_vm12, %vm937_vm11 }
 0x420   : > { %v933_v45 = vsub.f32 1.0, %v932_v0  ;;  %v961_v56 = vsel %vm960_vm1, %v1481_v12, %v957_v7  ;;  %v1398_v12 = vld [vmem:[%s1632_s28 + $0x2c] sm:$0x3] }
 0x421   : > { %v966_v58 = vsel %vm963_vm2, %v965_v57, %v961_v56  ;;  %v1212_v56 = vld [vmem:[%s248_s6 + $0x18] sm:$0xff] }
 0x422   : > { %v934_v2 = vmul.f32 %v1483_v44, %v933_v45  ;;  %v973_v59 = vsub.f32 1.0, %v966_v58  ;;  %v975_v62 = vmul.f32 %v966_v58, %v1757_v30  ;;  %1228 = vmatpush.msra.mxu0 %v1212_v56  ;;  %v1211_v58 = vld [vmem:[%s248_s6 + $0x10] sm:$0xff] }
 0x424   : > { %v935_v49 = vadd.f32 %v1483_v44, %v934_v2  ;;  %1229 = vmatpush.msra.mxu0 %v1211_v58 }
 0x426   : > { %v939_v50 = vsel %vm938_vm13, %v1483_v44, %v935_v49 }
 0x427   : > { %v944_v51 = vsel %vm941_vm14, %v943_v4, %v939_v50  ;;  %v1402_v50 = vld [vmem:[%s1632_s28 + $0xe] sm:$0x3] }
 0x428   : > { %v970_v53 = vmul.f32 %v944_v51, %v922_v5 }
 0x42a   : > { %v971_v55 = vadd.f32 %v1390_v9, %v970_v53  ;;  %v1404_v53 = vld [vmem:[%s1632_s28 + $0x1e] sm:$0x3] }
 0x42c   : > { %1484 = vtanh.f32 %v971_v55 }
 0x432   : > { %v1485_v60 = vpop.eup %1484 }
 0x433   : > { %v974_v61 = vmul.f32 %v1485_v60, %v973_v59  ;;  %v1210_v59 = vld [vmem:[%s248_s6 + $0x8] sm:$0xff]  ;;  %v1209_v60 = vld [vmem:[%s248_s6] sm:$0xff] }
 0x434   : > { %1230 = vmatpush.msra.mxu0 %v1210_v59 }
 0x435   : > { %v976_v63 = vadd.f32 %v975_v62, %v974_v61 }
 0x436   : > { %1231 = vmatpush.msra.mxu0 %v1209_v60 }
 0x437   : > { %1391 = vmatmul.msk.f32.vlgmr.msra.gmra.mxu2 %vm281_vm8, %v976_v63  ;;  %1392 = vmatmul.msk.f32.vlgmr.msra.gmra.mxu3 %vm281_vm8, %v976_v63 }
 0x438   : > { %1393 = vmatmul.msk.f32.vlgmr.msrb.gmra.mxu0 %vm281_vm8, %v976_v63 }
 0x4b5   : > { %v1037_v38 = vpop.f32.mrf.mxu0 }
 0x4b6   : > { %v1038_v6 = vadd.f32 %v1645_v33, %v1037_v38 }
 0x4ba   : > { %v997_v11 = vpop.f32.mrf.mxu2  ;;  %v1017_v16 = vpop.f32.mrf.mxu3 }
 0x4bb   : > { %v998_v18 = vadd.f32 %v1635_v13, %v997_v11  ;;  %v1018_v19 = vadd.f32 %v1638_v14, %v1017_v16 }
 0x4bd   : > { %v1042_v20 = vadd.f32 %v1394_v15, %v998_v18  ;;  %v1064_v21 = vadd.f32 %v1396_v17, %v1018_v19 }
 0x4bf   : > { %v1395_v22 = vmul.f32 -1.442695, %v1042_v20  ;;  %v1397_v23 = vmul.f32 -1.442695, %v1064_v21 }
 0x4c1   : > { %1486 = vpow2.f32 %v1395_v22 }
 0x4c2   : > { %1488 = vpow2.f32 %v1397_v23 }
 0x4c7   : > { %v1487_v24 = vpop.eup %1486 }
 0x4c8   : > { %v1489_v25 = vpop.eup %1488  ;;  %v1046_v26 = vadd.f32 1.0, %v1487_v24 }
 0x4c9   : > { %v1068_v27 = vadd.f32 1.0, %v1489_v25 }
 0x4ca   : > { %1490 = vrcp.f32 %v1046_v26  ;;  %v1058_v34 = vand.u32 2147483648, %v1046_v26  ;;  %v1056_v37 = vand.u32 2147483647, %v1046_v26  ;;  %vm1052_vm4 = vweird.f32 %v1046_v26 }
 0x4cb   : > { %1492 = vrcp.f32 %v1068_v27  ;;  %v1080_v44 = vand.u32 2147483648, %v1068_v27  ;;  %vm1074_vm9 = vweird.f32 %v1068_v27  ;;  %v1078_v0 = vand.u32 2147483647, %v1068_v27 }
 0x4cc   : > { %v1059_v41 = vor.u32 1.1754944e-38, %v1058_v34  ;;  %vm1057_vm6 = vcmp.eq.f32.partialorder %v1056_v37, 8.507059e+37 }
 0x4cd   : > { %v1081_v46 = vor.u32 1.1754944e-38, %v1080_v44  ;;  %vm1079_vm11 = vcmp.eq.f32.partialorder %v1078_v0, 8.507059e+37 }
 0x4d0   : > { %v1491_v28 = vpop.eup %1490 }
 0x4d1   : > { %v1493_v29 = vpop.eup %1492  ;;  %v1048_v30 = vmul.f32 %v1491_v28, %v1046_v26  ;;  %vm1053_vm3 = vweird.f32 %v1491_v28 }
 0x4d2   : > { %v1070_v31 = vmul.f32 %v1493_v29, %v1068_v27  ;;  %vm1054_vm5 = vmor %vm1052_vm4, %vm1053_vm3  ;;  %vm1075_vm7 = vweird.f32 %v1493_v29  ;;  %vm1236_vm4 = vcmask 123904  }
 0x4d3   : > { %v1049_v32 = vsub.f32 1.0, %v1048_v30  ;;  %vm1076_vm10 = vmor %vm1074_vm9, %vm1075_vm7 }
 0x4d4   : > { %v1071_v35 = vsub.f32 1.0, %v1070_v31 }
 0x4d5   : > { %v1050_v36 = vmul.f32 %v1491_v28, %v1049_v32 }
 0x4d6   : > { %v1072_v39 = vmul.f32 %v1493_v29, %v1071_v35 }
 0x4d7   : > { %v1051_v40 = vadd.f32 %v1491_v28, %v1050_v36 }
 0x4d8   : > { %v1073_v42 = vadd.f32 %v1493_v29, %v1072_v39 }
 0x4d9   : > { %v1055_v8 = vsel %vm1054_vm5, %v1491_v28, %v1051_v40  ;;  %v1406_v28 = vld [vmem:[%s1632_s28 + $0x2e] sm:$0x3] }
 0x4da   : > { %v1060_v10 = vsel %vm1057_vm6, %v1059_v41, %v1055_v8  ;;  %v1077_v45 = vsel %vm1076_vm10, %v1493_v29, %v1073_v42 }
 0x4db   : > { %v1086_v43 = vmul.f32 %v1060_v10, %v1038_v6  ;;  %v1082_v2 = vsel %vm1079_vm11, %v1081_v46, %v1077_v45 }
 0x4dc   : > { %v1089_v3 = vsub.f32 1.0, %v1082_v2  ;;  %v1091_v49 = vmul.f32 %v1082_v2, %v976_v63 }
 0x4dd   : > { %v1087_v1 = vadd.f32 %v1398_v12, %v1086_v43 }
 0x4df   : > { %1494 = vtanh.f32 %v1087_v1 }
 0x4e5   : > { %v1495_v47 = vpop.eup %1494 }
 0x4e6   : > { %v1090_v48 = vmul.f32 %v1495_v47, %v1089_v3 }
 0x4e8   : > { %v1785_v4 = vadd.f32 %v1091_v49, %v1090_v48 }
 0x4ea   : > { %1399 = vmatmul.msk.f32.vlgmr.msrb.gmra.mxu1 %vm281_vm8, %v1785_v4  ;;  %1400 = vmatmul.msk.f32.vlgmr.msrb.gmra.mxu2 %vm281_vm8, %v1785_v4 }
 0x4eb   : > { %1401 = vmatmul.msk.f32.vlgmr.msrb.gmra.mxu3 %vm281_vm8, %v1785_v4 }
 0x567   : > { %v1113_v5 = vpop.f32.mrf.mxu1 }
 0x568   : > { %v1114_v51 = vadd.f32 %v1635_v13, %v1113_v5 }
 0x56a   : > { %v1158_v7 = vadd.f32 %v1402_v50, %v1114_v51 }
 0x56c   : > { %v1403_v9 = vmul.f32 -1.442695, %v1158_v7 }
 0x56d   : > { %v1133_v52 = vpop.f32.mrf.mxu2 }
 0x56e   : > { %1496 = vpow2.f32 %v1403_v9  ;;  %v1134_v54 = vadd.f32 %v1638_v14, %v1133_v52  ;;  %v1153_v20 = vpop.f32.mrf.mxu3 }
 0x56f   : > { %v1154_v25 = vadd.f32 %v1645_v33, %v1153_v20 }
 0x570   : > { %v1180_v55 = vadd.f32 %v1404_v53, %v1134_v54 }
 0x572   : > { %v1405_v57 = vmul.f32 -1.442695, %v1180_v55 }
 0x574   : > { %v1497_v13 = vpop.eup %1496  ;;  %1498 = vpow2.f32 %v1405_v57 }
 0x575   : > { %v1162_v61 = vadd.f32 1.0, %v1497_v13 }
 0x577   : > { %1500 = vrcp.f32 %v1162_v61  ;;  %v1174_v16 = vand.u32 2147483648, %v1162_v61  ;;  %v1172_v18 = vand.u32 2147483647, %v1162_v61  ;;  %vm1168_vm13 = vweird.f32 %v1162_v61 }
 0x579   : > { %v1175_v23 = vor.u32 1.1754944e-38, %v1174_v16  ;;  %vm1173_vm15 = vcmp.eq.f32.partialorder %v1172_v18, 8.507059e+37 }
 0x57a   : > { %v1499_v62 = vpop.eup %1498 }
 0x57b   : > { %v1184_v63 = vadd.f32 1.0, %v1499_v62 }
 0x57d   : > { %v1501_v11 = vpop.eup %1500  ;;  %1502 = vrcp.f32 %v1184_v63  ;;  %v1196_v30 = vand.u32 2147483648, %v1184_v63  ;;  %v1194_v32 = vand.u32 2147483647, %v1184_v63  ;;  %vm1190_vm1 = vweird.f32 %v1184_v63 }
 0x57e   : > { %v1164_v15 = vmul.f32 %v1501_v11, %v1162_v61  ;;  %vm1169_vm12 = vweird.f32 %v1501_v11 }
 0x57f   : > { %vm1170_vm14 = vmor %vm1168_vm13, %vm1169_vm12  ;;  %v1197_v36 = vor.u32 1.1754944e-38, %v1196_v30  ;;  %vm1195_vm3 = vcmp.eq.f32.partialorder %v1194_v32, 8.507059e+37 }
 0x580   : > { %v1165_v14 = vsub.f32 1.0, %v1164_v15 }
 0x582   : > { %v1166_v17 = vmul.f32 %v1501_v11, %v1165_v14 }
 0x583   : > { %v1503_v19 = vpop.eup %1502 }
 0x584   : > { %v1186_v21 = vmul.f32 %v1503_v19, %v1184_v63  ;;  %v1167_v22 = vadd.f32 %v1501_v11, %v1166_v17  ;;  %vm1191_vm0 = vweird.f32 %v1503_v19 }
 0x585   : > { %vm1192_vm2 = vmor %vm1190_vm1, %vm1191_vm0 }
 0x586   : > { %v1187_v24 = vsub.f32 1.0, %v1186_v21  ;;  %v1171_v26 = vsel %vm1170_vm14, %v1501_v11, %v1167_v22 }
 0x587   : > { %v1176_v27 = vsel %vm1173_vm15, %v1175_v23, %v1171_v26 }
 0x588   : > { %v1188_v29 = vmul.f32 %v1503_v19, %v1187_v24  ;;  %v1202_v31 = vmul.f32 %v1176_v27, %v1154_v25 }
 0x58a   : > { %v1189_v34 = vadd.f32 %v1503_v19, %v1188_v29  ;;  %v1203_v35 = vadd.f32 %v1406_v28, %v1202_v31 }
 0x58c   : > { %v1193_v37 = vsel %vm1192_vm2, %v1503_v19, %v1189_v34  ;;  %1504 = vtanh.f32 %v1203_v35 }
 0x58d   : > { %v1198_v38 = vsel %vm1195_vm3, %v1197_v36, %v1193_v37 }
 0x58e   : > { %v1205_v33 = vsub.f32 1.0, %v1198_v38  ;;  %v1207_v41 = vmul.f32 %v1198_v38, %v1785_v4 }
 0x592   : > { %v1505_v39 = vpop.eup %1504 }
 0x593   : > { %v1206_v40 = vmul.f32 %v1505_v39, %v1205_v33 }
 0x595   : > { %v1208_v6 = vadd.f32 %v1207_v41, %v1206_v40 }
 0x597   : > { %1407 = vmatmul.msk.f32.vlgmr.msra.gmra.mxu0 %vm281_vm8, %v1208_v6 }
 0x614   : > { %v1233_v8 = vpop.f32.mrf.mxu0 }
 0x615   : > { %1237 = vst.msk [vmem:[%s252_s10] sm:$0x3] %vm1236_vm4, %v1233_v8 }
 0x616 PF: > { %s14_s15 = sadd.s32 1, %s1512_s15  }
 0x617   : > { %p11_p4 = scmp.ge.s32.totalorder %s14_s15, 4  }
 0x619   :  { %13 = sbr.rel (!%p11_p4) target bundleno = 1 (0x1), region = 102 }

</bundles_post_ra>
